<compile_context>
chip_gen: v7x
topology: tpu7x:2x2x1
jax: 0.10.0
libtpu: 0.0.40
codegen_flags: <defaults>
</compile_context>

<pallas_src>
import math

import jax
import jax.numpy as jnp
from jax.experimental import pallas as pl
from jax.experimental.pallas import tpu as pltpu


# ----------------------------- parameter packing ---------------------------- #

_ALPHA_ORDER = ("r1_pa", "r1_po", "r2_pa", "r2_po", "r3_pa", "r3_po")


def _weight_layout(E, H, C3):
    # (name, rows, cols) of every kernel_size=1 conv weight, stored as (in_ch, out_ch).
    entries = [("w1", C3, E),
               ("r1_wa", E, E), ("r1_wb", E, E),
               ("r2_wa", E, H), ("r2_ws", E, H), ("r2_wb", H, H),
               ("r3_wa", H, H), ("r3_wb", H, H),
               ("w6", H, E)]
    layout, off = {}, 0
    for name, rows, cols in entries:
        layout[name] = (off, rows, cols)
        off += rows
    return layout, off


def _vector_layout(E, H, C3):
    entries = [("ln_w", C3), ("ln_b", C3), ("b1", E),
               ("r1_ba", E), ("r1_bb", E),
               ("r2_ba", H), ("r2_bb", H),
               ("r3_ba", H), ("r3_bb", H),
               ("b6", E)]
    return {name: (row, cols) for row, (name, cols) in enumerate(entries)}


def _pack_params(p, E, H, C3):
    wl, wrows = _weight_layout(E, H, C3)
    wslab = jnp.zeros((wrows, C3), jnp.float32)
    for name, (off, rows, cols) in wl.items():
        wslab = wslab.at[off:off + rows, 0:cols].set(p[name])
    wslab = wslab.astype(jnp.bfloat16)           # weights feed single-pass bf16 MXU

    vl = _vector_layout(E, H, C3)
    vslab = jnp.zeros((len(vl), C3), jnp.float32)
    for name, (row, cols) in vl.items():
        vslab = vslab.at[row, 0:cols].set(p[name].reshape(-1))

    alphas = jnp.stack([p[k].reshape(()) for k in _ALPHA_ORDER]).astype(jnp.float32)
    return wslab, vslab, alphas, wl, vl


# --------------------------------- kernel ----------------------------------- #

def _make_kernel(wl, vl):
    def kernel(x_ref, w_ref, v_ref, a_ref, o_ref):
        def wtile(name):                     # bf16 weight window from the packed slab
            off, rows, cols = wl[name]
            return w_ref[off:off + rows, 0:cols]

        def vrow(name):                      # (1, cols) f32 bias / affine row
            row, cols = vl[name]
            return v_ref[row:row + 1, 0:cols]

        def dot(act, name):                  # bf16 x bf16 -> f32 accumulate (1 MXU pass)
            return jnp.dot(act.astype(jnp.bfloat16), wtile(name),
                           preferred_element_type=jnp.float32)

        def prelu(val, idx):                 # PReLU alpha read as an SMEM scalar
            a = a_ref[idx]
            return jnp.where(val > 0, val, val * a)

        def pool3_max(val):
            # Time axis is base-3 digit-reversed (batch innermost), so MaxPool1d(3)
            # is an elementwise max of three contiguous row blocks (pure VPU work).
            g = val.shape[0] // 3
            return jnp.maximum(jnp.maximum(val[0:g], val[g:2 * g]), val[2 * g:3 * g])

        x = x_ref[...]                                           # (N*T0, 3E) f32

        # ChannelWiseLayerNorm: normalize across channels per time step (biased var).
        mu = jnp.mean(x, axis=-1, keepdims=True)
        var = jnp.mean((x - mu) ** 2, axis=-1, keepdims=True)
        y = (x - mu) * jax.lax.rsqrt(var + 1e-5)
        y = y * vrow("ln_w") + vrow("ln_b")

        # Conv1d(3E -> E, k=1) with bias.
        y = dot(y, "w1") + vrow("b1")                            # (N*T0, E)

        # ResNetBlock(E, E): conv-BN-PReLU-conv-BN + identity skip, PReLU, MaxPool(3).
        h = prelu(dot(y, "r1_wa") + vrow("r1_ba"), 0)
        h = dot(h, "r1_wb") + vrow("r1_bb")
        z = pool3_max(prelu(h + y, 1))                           # (N*T0/3, E)

        # ResNetBlock(E, H): 1x1 conv on the skip path.
        h = prelu(dot(z, "r2_wa") + vrow("r2_ba"), 2)
        h = dot(h, "r2_wb") + vrow("r2_bb")
        z = pool3_max(prelu(h + dot(z, "r2_ws"), 3))             # (N*T0/9, H)

        # ResNetBlock(H, H): identity skip.
        h = prelu(dot(z, "r3_wa") + vrow("r3_ba"), 4)
        h = dot(h, "r3_wb") + vrow("r3_bb")
        z = pool3_max(prelu(h + z, 5))                           # (N*T0/27, H)

        # Fused tail: AvgPool1d(3) + mean over time commute with the 1x1 conv w6
        # (exact because T0 == 81), so take the per-batch time mean first.
        n = z.shape[0] // 3                                      # == N
        zm = (z[0:n] + z[n:2 * n] + z[2 * n:3 * n]) * (1.0 / 3.0)   # (N, H)
        o_ref[...] = dot(zm, "w6") + vrow("b6")                  # (N, E)

    return kernel


# -------------------------------- wrapper ------------------------------------ #

def speaker_encoder_forward(x1, x2, x3, params, embed_dim, hidden):
    # PyTorch-style inputs (N, E, T); concat on channels, then go channels-last.
    x = jnp.concatenate([x1, x2, x3], axis=1)                # (N, 3E, T)
    x = jnp.transpose(x, (0, 2, 1)).astype(jnp.float32)      # (N, T, 3E)
    N, T0, C3 = x.shape
    E, H = embed_dim, hidden
    # TODO(synk): the fused pooling layout assumes T0 == 81 (all pools divide evenly);
    # general T0 would need the remainder-truncating pool path of the original module.
    assert T0 == 81, "kernel assumes T0 == 81 (= 3**4)"

    # Base-3 digit-reversal of the time axis, batch innermost: row index becomes
    # b + N*(27*a0 + 9*a1 + 3*a2 + a3) for t = 27*a3 + 9*a2 + 3*a1 + a0, so every
    # stride-3 pooling stage is three contiguous blocks of rows inside the kernel.
    x5 = x.reshape(N, 3, 3, 3, 3, C3)                        # (b, a3, a2, a1, a0, C)
    xp = jnp.transpose(x5, (4, 3, 2, 1, 0, 5)).reshape(N * T0, C3)

    wslab, vslab, alphas, wl, vl = _pack_params(params, E, H, C3)
    kernel = _make_kernel(wl, vl)

    out = pl.pallas_call(
        kernel,
        out_shape=jax.ShapeDtypeStruct((N, E), jnp.float32),
        in_specs=[pl.BlockSpec(memory_space=pltpu.MemorySpace.VMEM),   # x (permuted)
                  pl.BlockSpec(memory_space=pltpu.MemorySpace.VMEM),   # weight slab
                  pl.BlockSpec(memory_space=pltpu.MemorySpace.VMEM),   # bias slab
                  pl.BlockSpec(memory_space=pltpu.MemorySpace.SMEM)],  # PReLU alphas
        out_specs=pl.BlockSpec(memory_space=pltpu.MemorySpace.VMEM),
    )(xp, wslab, vslab, alphas)
    return out                                               # (N, E)


# ------------------------------ parameters ---------------------------------- #

def make_params(key, embed_dim, hidden):
    E, H, C3 = embed_dim, hidden, 3 * embed_dim
    keys = iter(jax.random.split(key, 64))

    def xavier(shape):                                       # shape = (out_ch, in_ch)
        fan_out, fan_in = shape
        a = math.sqrt(6.0 / (fan_in + fan_out))
        return jax.random.uniform(next(keys), shape, jnp.float32, -a, a)

    def bn_affine(c):
        gamma = jax.random.uniform(next(keys), (c,), jnp.float32, 0.5, 1.5)
        beta = 0.1 * jax.random.normal(next(keys), (c,), jnp.float32)
        # eval-mode BN with default running stats: scale = gamma/sqrt(1+eps), shift = beta
        return gamma / jnp.sqrt(1.0 + 1e-5), beta

    p = {}
    p["ln_w"] = jax.random.uniform(next(keys), (1, C3), jnp.float32, 0.5, 1.5)
    p["ln_b"] = 0.1 * jax.random.normal(next(keys), (1, C3), jnp.float32)
    p["w1"] = xavier((E, C3)).T                              # (C3, E), conv bias init = 0
    p["b1"] = jnp.zeros((1, E), jnp.float32)

    def resblock(prefix, cin, cout, skip):
        sa, ba = bn_affine(cout)
        sb, bb = bn_affine(cout)
        wa = xavier((cout, cin))
        wb = xavier((cout, cout))
        p[prefix + "_wa"] = (wa * sa[:, None]).T             # BN folded, (cin, cout)
        p[prefix + "_ba"] = ba[None, :]
        p[prefix + "_wb"] = (wb * sb[:, None]).T
        p[prefix + "_bb"] = bb[None, :]
        if skip:
            p[prefix + "_ws"] = xavier((cout, cin)).T
        p[prefix + "_pa"] = jnp.full((1, 1), 0.25, jnp.float32)   # PReLU default init
        p[prefix + "_po"] = jnp.full((1, 1), 0.25, jnp.float32)

    resblock("r1", E, E, skip=False)
    resblock("r2", E, H, skip=True)
    resblock("r3", H, H, skip=False)
    p["w6"] = xavier((E, H)).T                               # (H, E)
    p["b6"] = jnp.zeros((1, E), jnp.float32)
    return p


# -------------------------- pure-JAX reference ------------------------------- #

def reference_forward(x1, x2, x3, p):
    x = jnp.concatenate([x1, x2, x3], axis=1)
    x = jnp.transpose(x, (0, 2, 1)).astype(jnp.float32)      # (N, T, 3E)

    def mm(a, w):   # same operand precision as the kernel: bf16 in, f32 accumulate
        return jnp.dot(a.astype(jnp.bfloat16), w.astype(jnp.bfloat16),
                       preferred_element_type=jnp.float32)

    def prelu(v, a):
        return jnp.where(v > 0, v, a[0, 0] * v)

    def maxpool3(v):
        n, t, c = v.shape
        return jnp.max(v[:, : (t // 3) * 3].reshape(n, t // 3, 3, c), axis=2)

    mu = x.mean(-1, keepdims=True)
    var = ((x - mu) ** 2).mean(-1, keepdims=True)
    y = (x - mu) * jax.lax.rsqrt(var + 1e-5) * p["ln_w"][0] + p["ln_b"][0]
    y = mm(y, p["w1"]) + p["b1"][0]

    h = prelu(mm(y, p["r1_wa"]) + p["r1_ba"][0], p["r1_pa"])
    h = mm(h, p["r1_wb"]) + p["r1_bb"][0]
    z = maxpool3(prelu(h + y, p["r1_po"]))

    h = prelu(mm(z, p["r2_wa"]) + p["r2_ba"][0], p["r2_pa"])
    h = mm(h, p["r2_wb"]) + p["r2_bb"][0]
    z = maxpool3(prelu(h + mm(z, p["r2_ws"]), p["r2_po"]))

    h = prelu(mm(z, p["r3_wa"]) + p["r3_ba"][0], p["r3_pa"])
    h = mm(h, p["r3_wb"]) + p["r3_bb"][0]
    z = maxpool3(prelu(h + z, p["r3_po"]))

    y6 = mm(z, p["w6"]) + p["b6"][0]
    n, t, c = y6.shape
    avg = jnp.mean(y6[:, : (t // 3) * 3].reshape(n, t // 3, 3, c), axis=2)
    return jnp.mean(avg, axis=1)                             # (N, E)


# ---------------------------------- main ------------------------------------- #

if __name__ == "__main__":
    EMBED_DIM, HIDDEN, L1 = 16, 32, 20                       # L1 is unused by forward()
    N, T = 2, 81                                             # 81 -> 27 -> 9 -> 3 -> 1 after pools

    key = jax.random.PRNGKey(0)
    kp, k1, k2, k3 = jax.random.split(key, 4)
    params = make_params(kp, EMBED_DIM, HIDDEN)
    x1 = jax.random.normal(k1, (N, EMBED_DIM, T), jnp.float32)
    x2 = jax.random.normal(k2, (N, EMBED_DIM, T), jnp.float32)
    x3 = jax.random.normal(k3, (N, EMBED_DIM, T), jnp.float32)

    out = speaker_encoder_forward(x1, x2, x3, params, EMBED_DIM, HIDDEN)
    out = jax.block_until_ready(out)

    ref = reference_forward(x1, x2, x3, params)
    assert out.shape == (N, EMBED_DIM), out.shape
    assert bool(jnp.all(jnp.isfinite(out)))
    assert bool(jnp.allclose(out, ref, rtol=1e-2, atol=1e-2)), (out, ref)

    print("KERNEL_OK")
</pallas_src>

<mosaic_0001>
module attributes {stable_mosaic.version = 11 : i64} {
  func.func @kernel(%arg0: memref<162x48xf32, #tpu.memory_space<vmem>>, %arg1: memref<240x48xbf16, #tpu.memory_space<vmem>>, %arg2: memref<10x48xf32, #tpu.memory_space<vmem>>, %arg3: memref<6xf32, #tpu.memory_space<smem>>, %arg4: memref<2x16xf32, #tpu.memory_space<vmem>>) attributes {dimension_semantics = [], scalar_prefetch = 0 : i64, scratch_operands = 0 : i64, tpu.core_type = #tpu.core_type<tc>} {
    %c0 = arith.constant 0 : index
    %c0_0 = arith.constant 0 : index
    %0 = vector.load %arg0[%c0, %c0_0] : memref<162x48xf32, #tpu.memory_space<vmem>>, vector<162x48xf32>
    %cst = arith.constant dense<0.000000e+00> : vector<162xf32>
    %1 = vector.multi_reduction <add>, %0, %cst [1] : vector<162x48xf32> to vector<162xf32>
    %2 = vector.shape_cast %1 : vector<162xf32> to vector<162x1xf32>
    %cst_1 = arith.constant 4.800000e+01 : f32
    %3 = vector.broadcast %cst_1 : f32 to vector<162x1xf32>
    %4 = arith.divf %2, %3 : vector<162x1xf32>
    %5 = vector.broadcast %4 : vector<162x1xf32> to vector<162x48xf32>
    %6 = arith.subf %0, %5 : vector<162x48xf32>
    %7 = arith.mulf %6, %6 : vector<162x48xf32>
    %cst_2 = arith.constant dense<0.000000e+00> : vector<162xf32>
    %8 = vector.multi_reduction <add>, %7, %cst_2 [1] : vector<162x48xf32> to vector<162xf32>
    %9 = vector.shape_cast %8 : vector<162xf32> to vector<162x1xf32>
    %cst_3 = arith.constant 4.800000e+01 : f32
    %10 = vector.broadcast %cst_3 : f32 to vector<162x1xf32>
    %11 = arith.divf %9, %10 : vector<162x1xf32>
    %12 = vector.broadcast %4 : vector<162x1xf32> to vector<162x48xf32>
    %13 = arith.subf %0, %12 : vector<162x48xf32>
    %cst_4 = arith.constant 9.99999974E-6 : f32
    %14 = vector.broadcast %cst_4 : f32 to vector<162x1xf32>
    %15 = arith.addf %11, %14 : vector<162x1xf32>
    %16 = math.rsqrt %15 : vector<162x1xf32>
    %17 = vector.broadcast %16 : vector<162x1xf32> to vector<162x48xf32>
    %18 = arith.mulf %13, %17 : vector<162x48xf32>
    %c0_5 = arith.constant 0 : index
    %c0_6 = arith.constant 0 : index
    %19 = vector.load %arg2[%c0_5, %c0_6] : memref<10x48xf32, #tpu.memory_space<vmem>>, vector<1x48xf32>
    %20 = vector.broadcast %19 : vector<1x48xf32> to vector<162x48xf32>
    %21 = arith.mulf %18, %20 : vector<162x48xf32>
    %c1 = arith.constant 1 : index
    %c0_7 = arith.constant 0 : index
    %22 = vector.load %arg2[%c1, %c0_7] : memref<10x48xf32, #tpu.memory_space<vmem>>, vector<1x48xf32>
    %23 = vector.broadcast %22 : vector<1x48xf32> to vector<162x48xf32>
    %24 = arith.addf %21, %23 : vector<162x48xf32>
    %25 = arith.truncf %24 : vector<162x48xf32> to vector<162x48xbf16>
    %c0_8 = arith.constant 0 : index
    %c0_9 = arith.constant 0 : index
    %26 = vector.load %arg1[%c0_8, %c0_9] : memref<240x48xbf16, #tpu.memory_space<vmem>>, vector<48x16xbf16>
    %cst_10 = arith.constant dense<0.000000e+00> : vector<162x16xf32>
    %27 = tpu.matmul %25, %26, %cst_10 {dimension_numbers = #tpu.dot_dimension_numbers<[1], [0], [0], [1], [0, 0, 1, 1], [], []>} : vector<162x48xbf16>, vector<48x16xbf16>, vector<162x16xf32> -> vector<162x16xf32>
    %c2 = arith.constant 2 : index
    %c0_11 = arith.constant 0 : index
    %28 = vector.load %arg2[%c2, %c0_11] : memref<10x48xf32, #tpu.memory_space<vmem>>, vector<1x16xf32>
    %29 = vector.broadcast %28 : vector<1x16xf32> to vector<162x16xf32>
    %30 = arith.addf %27, %29 : vector<162x16xf32>
    %31 = arith.truncf %30 : vector<162x16xf32> to vector<162x16xbf16>
    %c48 = arith.constant 48 : index
    %c0_12 = arith.constant 0 : index
    %32 = vector.load %arg1[%c48, %c0_12] : memref<240x48xbf16, #tpu.memory_space<vmem>>, vector<16x16xbf16>
    %cst_13 = arith.constant dense<0.000000e+00> : vector<162x16xf32>
    %33 = tpu.matmul %31, %32, %cst_13 {dimension_numbers = #tpu.dot_dimension_numbers<[1], [0], [0], [1], [0, 0, 1, 1], [], []>} : vector<162x16xbf16>, vector<16x16xbf16>, vector<162x16xf32> -> vector<162x16xf32>
    %c3 = arith.constant 3 : index
    %c0_14 = arith.constant 0 : index
    %34 = vector.load %arg2[%c3, %c0_14] : memref<10x48xf32, #tpu.memory_space<vmem>>, vector<1x16xf32>
    %35 = vector.broadcast %34 : vector<1x16xf32> to vector<162x16xf32>
    %36 = arith.addf %33, %35 : vector<162x16xf32>
    %c0_15 = arith.constant 0 : index
    %37 = memref.load %arg3[%c0_15] : memref<6xf32, #tpu.memory_space<smem>>
    %cst_16 = arith.constant 0.000000e+00 : f32
    %38 = vector.broadcast %cst_16 : f32 to vector<162x16xf32>
    %39 = arith.cmpf ogt, %36, %38 : vector<162x16xf32>
    %40 = vector.broadcast %37 : f32 to vector<162x16xf32>
    %41 = arith.mulf %36, %40 : vector<162x16xf32>
    %42 = arith.select %39, %36, %41 : vector<162x16xi1>, vector<162x16xf32>
    %43 = arith.truncf %42 : vector<162x16xf32> to vector<162x16xbf16>
    %c64 = arith.constant 64 : index
    %c0_17 = arith.constant 0 : index
    %44 = vector.load %arg1[%c64, %c0_17] : memref<240x48xbf16, #tpu.memory_space<vmem>>, vector<16x16xbf16>
    %cst_18 = arith.constant dense<0.000000e+00> : vector<162x16xf32>
    %45 = tpu.matmul %43, %44, %cst_18 {dimension_numbers = #tpu.dot_dimension_numbers<[1], [0], [0], [1], [0, 0, 1, 1], [], []>} : vector<162x16xbf16>, vector<16x16xbf16>, vector<162x16xf32> -> vector<162x16xf32>
    %c4 = arith.constant 4 : index
    %c0_19 = arith.constant 0 : index
    %46 = vector.load %arg2[%c4, %c0_19] : memref<10x48xf32, #tpu.memory_space<vmem>>, vector<1x16xf32>
    %47 = vector.broadcast %46 : vector<1x16xf32> to vector<162x16xf32>
    %48 = arith.addf %45, %47 : vector<162x16xf32>
    %49 = arith.addf %48, %30 : vector<162x16xf32>
    %c1_20 = arith.constant 1 : index
    %50 = memref.load %arg3[%c1_20] : memref<6xf32, #tpu.memory_space<smem>>
    %cst_21 = arith.constant 0.000000e+00 : f32
    %51 = vector.broadcast %cst_21 : f32 to vector<162x16xf32>
    %52 = arith.cmpf ogt, %49, %51 : vector<162x16xf32>
    %53 = vector.broadcast %50 : f32 to vector<162x16xf32>
    %54 = arith.mulf %49, %53 : vector<162x16xf32>
    %55 = arith.select %52, %49, %54 : vector<162x16xi1>, vector<162x16xf32>
    %56 = vector.extract_strided_slice %55 {offsets = [0, 0], sizes = [54, 16], strides = [1, 1]} : vector<162x16xf32> to vector<54x16xf32>
    %57 = vector.extract_strided_slice %55 {offsets = [54, 0], sizes = [54, 16], strides = [1, 1]} : vector<162x16xf32> to vector<54x16xf32>
    %58 = arith.maximumf %56, %57 : vector<54x16xf32>
    %59 = vector.extract_strided_slice %55 {offsets = [108, 0], sizes = [54, 16], strides = [1, 1]} : vector<162x16xf32> to vector<54x16xf32>
    %60 = arith.maximumf %58, %59 : vector<54x16xf32>
    %61 = arith.truncf %60 : vector<54x16xf32> to vector<54x16xbf16>
    %c80 = arith.constant 80 : index
    %c0_22 = arith.constant 0 : index
    %62 = vector.load %arg1[%c80, %c0_22] : memref<240x48xbf16, #tpu.memory_space<vmem>>, vector<16x32xbf16>
    %cst_23 = arith.constant dense<0.000000e+00> : vector<54x32xf32>
    %63 = tpu.matmul %61, %62, %cst_23 {dimension_numbers = #tpu.dot_dimension_numbers<[1], [0], [0], [1], [0, 0, 1, 1], [], []>} : vector<54x16xbf16>, vector<16x32xbf16>, vector<54x32xf32> -> vector<54x32xf32>
    %c5 = arith.constant 5 : index
    %c0_24 = arith.constant 0 : index
    %64 = vector.load %arg2[%c5, %c0_24] : memref<10x48xf32, #tpu.memory_space<vmem>>, vector<1x32xf32>
    %65 = vector.broadcast %64 : vector<1x32xf32> to vector<54x32xf32>
    %66 = arith.addf %63, %65 : vector<54x32xf32>
    %c2_25 = arith.constant 2 : index
    %67 = memref.load %arg3[%c2_25] : memref<6xf32, #tpu.memory_space<smem>>
    %cst_26 = arith.constant 0.000000e+00 : f32
    %68 = vector.broadcast %cst_26 : f32 to vector<54x32xf32>
    %69 = arith.cmpf ogt, %66, %68 : vector<54x32xf32>
    %70 = vector.broadcast %67 : f32 to vector<54x32xf32>
    %71 = arith.mulf %66, %70 : vector<54x32xf32>
    %72 = arith.select %69, %66, %71 : vector<54x32xi1>, vector<54x32xf32>
    %73 = arith.truncf %72 : vector<54x32xf32> to vector<54x32xbf16>
    %c112 = arith.constant 112 : index
    %c0_27 = arith.constant 0 : index
    %74 = vector.load %arg1[%c112, %c0_27] : memref<240x48xbf16, #tpu.memory_space<vmem>>, vector<32x32xbf16>
    %cst_28 = arith.constant dense<0.000000e+00> : vector<54x32xf32>
    %75 = tpu.matmul %73, %74, %cst_28 {dimension_numbers = #tpu.dot_dimension_numbers<[1], [0], [0], [1], [0, 0, 1, 1], [], []>} : vector<54x32xbf16>, vector<32x32xbf16>, vector<54x32xf32> -> vector<54x32xf32>
    %c6 = arith.constant 6 : index
    %c0_29 = arith.constant 0 : index
    %76 = vector.load %arg2[%c6, %c0_29] : memref<10x48xf32, #tpu.memory_space<vmem>>, vector<1x32xf32>
    %77 = vector.broadcast %76 : vector<1x32xf32> to vector<54x32xf32>
    %78 = arith.addf %75, %77 : vector<54x32xf32>
    %79 = arith.truncf %60 : vector<54x16xf32> to vector<54x16xbf16>
    %c96 = arith.constant 96 : index
    %c0_30 = arith.constant 0 : index
    %80 = vector.load %arg1[%c96, %c0_30] : memref<240x48xbf16, #tpu.memory_space<vmem>>, vector<16x32xbf16>
    %cst_31 = arith.constant dense<0.000000e+00> : vector<54x32xf32>
    %81 = tpu.matmul %79, %80, %cst_31 {dimension_numbers = #tpu.dot_dimension_numbers<[1], [0], [0], [1], [0, 0, 1, 1], [], []>} : vector<54x16xbf16>, vector<16x32xbf16>, vector<54x32xf32> -> vector<54x32xf32>
    %82 = arith.addf %78, %81 : vector<54x32xf32>
    %c3_32 = arith.constant 3 : index
    %83 = memref.load %arg3[%c3_32] : memref<6xf32, #tpu.memory_space<smem>>
    %cst_33 = arith.constant 0.000000e+00 : f32
    %84 = vector.broadcast %cst_33 : f32 to vector<54x32xf32>
    %85 = arith.cmpf ogt, %82, %84 : vector<54x32xf32>
    %86 = vector.broadcast %83 : f32 to vector<54x32xf32>
    %87 = arith.mulf %82, %86 : vector<54x32xf32>
    %88 = arith.select %85, %82, %87 : vector<54x32xi1>, vector<54x32xf32>
    %89 = vector.extract_strided_slice %88 {offsets = [0, 0], sizes = [18, 32], strides = [1, 1]} : vector<54x32xf32> to vector<18x32xf32>
    %90 = vector.extract_strided_slice %88 {offsets = [18, 0], sizes = [18, 32], strides = [1, 1]} : vector<54x32xf32> to vector<18x32xf32>
    %91 = arith.maximumf %89, %90 : vector<18x32xf32>
    %92 = vector.extract_strided_slice %88 {offsets = [36, 0], sizes = [18, 32], strides = [1, 1]} : vector<54x32xf32> to vector<18x32xf32>
    %93 = arith.maximumf %91, %92 : vector<18x32xf32>
    %94 = arith.truncf %93 : vector<18x32xf32> to vector<18x32xbf16>
    %c144 = arith.constant 144 : index
    %c0_34 = arith.constant 0 : index
    %95 = vector.load %arg1[%c144, %c0_34] : memref<240x48xbf16, #tpu.memory_space<vmem>>, vector<32x32xbf16>
    %cst_35 = arith.constant dense<0.000000e+00> : vector<18x32xf32>
    %96 = tpu.matmul %94, %95, %cst_35 {dimension_numbers = #tpu.dot_dimension_numbers<[1], [0], [0], [1], [0, 0, 1, 1], [], []>} : vector<18x32xbf16>, vector<32x32xbf16>, vector<18x32xf32> -> vector<18x32xf32>
    %c7 = arith.constant 7 : index
    %c0_36 = arith.constant 0 : index
    %97 = vector.load %arg2[%c7, %c0_36] : memref<10x48xf32, #tpu.memory_space<vmem>>, vector<1x32xf32>
    %98 = vector.broadcast %97 : vector<1x32xf32> to vector<18x32xf32>
    %99 = arith.addf %96, %98 : vector<18x32xf32>
    %c4_37 = arith.constant 4 : index
    %100 = memref.load %arg3[%c4_37] : memref<6xf32, #tpu.memory_space<smem>>
    %cst_38 = arith.constant 0.000000e+00 : f32
    %101 = vector.broadcast %cst_38 : f32 to vector<18x32xf32>
    %102 = arith.cmpf ogt, %99, %101 : vector<18x32xf32>
    %103 = vector.broadcast %100 : f32 to vector<18x32xf32>
    %104 = arith.mulf %99, %103 : vector<18x32xf32>
    %105 = arith.select %102, %99, %104 : vector<18x32xi1>, vector<18x32xf32>
    %106 = arith.truncf %105 : vector<18x32xf32> to vector<18x32xbf16>
    %c176 = arith.constant 176 : index
    %c0_39 = arith.constant 0 : index
    %107 = vector.load %arg1[%c176, %c0_39] : memref<240x48xbf16, #tpu.memory_space<vmem>>, vector<32x32xbf16>
    %cst_40 = arith.constant dense<0.000000e+00> : vector<18x32xf32>
    %108 = tpu.matmul %106, %107, %cst_40 {dimension_numbers = #tpu.dot_dimension_numbers<[1], [0], [0], [1], [0, 0, 1, 1], [], []>} : vector<18x32xbf16>, vector<32x32xbf16>, vector<18x32xf32> -> vector<18x32xf32>
    %c8 = arith.constant 8 : index
    %c0_41 = arith.constant 0 : index
    %109 = vector.load %arg2[%c8, %c0_41] : memref<10x48xf32, #tpu.memory_space<vmem>>, vector<1x32xf32>
    %110 = vector.broadcast %109 : vector<1x32xf32> to vector<18x32xf32>
    %111 = arith.addf %108, %110 : vector<18x32xf32>
    %112 = arith.addf %111, %93 : vector<18x32xf32>
    %c5_42 = arith.constant 5 : index
    %113 = memref.load %arg3[%c5_42] : memref<6xf32, #tpu.memory_space<smem>>
    %cst_43 = arith.constant 0.000000e+00 : f32
    %114 = vector.broadcast %cst_43 : f32 to vector<18x32xf32>
    %115 = arith.cmpf ogt, %112, %114 : vector<18x32xf32>
    %116 = vector.broadcast %113 : f32 to vector<18x32xf32>
    %117 = arith.mulf %112, %116 : vector<18x32xf32>
    %118 = arith.select %115, %112, %117 : vector<18x32xi1>, vector<18x32xf32>
    %119 = vector.extract_strided_slice %118 {offsets = [0, 0], sizes = [6, 32], strides = [1, 1]} : vector<18x32xf32> to vector<6x32xf32>
    %120 = vector.extract_strided_slice %118 {offsets = [6, 0], sizes = [6, 32], strides = [1, 1]} : vector<18x32xf32> to vector<6x32xf32>
    %121 = arith.maximumf %119, %120 : vector<6x32xf32>
    %122 = vector.extract_strided_slice %118 {offsets = [12, 0], sizes = [6, 32], strides = [1, 1]} : vector<18x32xf32> to vector<6x32xf32>
    %123 = arith.maximumf %121, %122 : vector<6x32xf32>
    %124 = vector.extract_strided_slice %123 {offsets = [0, 0], sizes = [2, 32], strides = [1, 1]} : vector<6x32xf32> to vector<2x32xf32>
    %125 = vector.extract_strided_slice %123 {offsets = [2, 0], sizes = [2, 32], strides = [1, 1]} : vector<6x32xf32> to vector<2x32xf32>
    %126 = arith.addf %124, %125 : vector<2x32xf32>
    %127 = vector.extract_strided_slice %123 {offsets = [4, 0], sizes = [2, 32], strides = [1, 1]} : vector<6x32xf32> to vector<2x32xf32>
    %128 = arith.addf %126, %127 : vector<2x32xf32>
    %cst_44 = arith.constant 0.333333343 : f32
    %129 = vector.broadcast %cst_44 : f32 to vector<2x32xf32>
    %130 = arith.mulf %128, %129 : vector<2x32xf32>
    %131 = arith.truncf %130 : vector<2x32xf32> to vector<2x32xbf16>
    %c208 = arith.constant 208 : index
    %c0_45 = arith.constant 0 : index
    %132 = vector.load %arg1[%c208, %c0_45] : memref<240x48xbf16, #tpu.memory_space<vmem>>, vector<32x16xbf16>
    %cst_46 = arith.constant dense<0.000000e+00> : vector<2x16xf32>
    %133 = tpu.matmul %131, %132, %cst_46 {dimension_numbers = #tpu.dot_dimension_numbers<[1], [0], [0], [1], [0, 0, 1, 1], [], []>} : vector<2x32xbf16>, vector<32x16xbf16>, vector<2x16xf32> -> vector<2x16xf32>
    %c9 = arith.constant 9 : index
    %c0_47 = arith.constant 0 : index
    %134 = vector.load %arg2[%c9, %c0_47] : memref<10x48xf32, #tpu.memory_space<vmem>>, vector<1x16xf32>
    %135 = vector.broadcast %134 : vector<1x16xf32> to vector<2x16xf32>
    %136 = arith.addf %133, %135 : vector<2x16xf32>
    %c0_48 = arith.constant 0 : index
    %c0_49 = arith.constant 0 : index
    %137 = vector.load %arg4[%c0_48, %c0_49] : memref<2x16xf32, #tpu.memory_space<vmem>>, vector<2x16xf32>
    tpu.vector_store %arg4[%c0_48, %c0_49], %136 {strides = array<i32>} : memref<2x16xf32, #tpu.memory_space<vmem>>, vector<2x16xf32>,
    return
  }
}

</mosaic_0001>

<bundles_post_ra>
// kernel: tpu_custom_call.1
= control target key start
LH: loop header
LB: loop body
LE: loop exit
PB: predicated region body
PF: predicated region fallthrough
CT: control target
= control target key end

     0   :  { %9 = vsyncpa [#allocation4], 0  ;;  %s3122_s0 = inlined_call_operand.vmem [shape: f32[162,48], index: 0, kind: input, shape index: {}]   ;;  %s3123_s1 = inlined_call_operand.vmem [shape: bf16[240,48], index: 1, kind: input, shape index: {}]   ;;  %s3124_s2 = inlined_call_operand.vmem [shape: f32[10,48], index: 2, kind: input, shape index: {}]   ;;  %s3125_s3 = inlined_call_operand.vmem [shape: f32[6], index: 3, kind: input, shape index: {}]   ;;  %s3126_s4 = inlined_call_operand.hbm [shape: f32[2,16], index: 4, kind: output, shape index: {}]  }
   0x1   :  { %10 = vsyncpa [#allocation3], 0  ;;  %s23_s17 = sshll.u32 %s3125_s3, 4  ;;  %s24_s17 = int_to_ptr.vmem [resolvable:$true] %s23_s17 }
   0x2   :  { %s2204_s18 = scalar_lea.vmem %s24_s17, 16  ;;  %p2209_p1 = scmp.lt.s32.totalorder %s24_s17, %s24_s17 }
   0x3   :  { %p2205_p0 = scmp.ne.s32.totalorder %s24_s17, %s2204_s18  ;;  %p2210_p2 = scmp.lt.s32.totalorder %s2204_s18, %s2204_s18 }
   0x5   :  { %p2211_p3 = por %p2210_p2, %p2209_p1 }
   0x7   :  { %p2212_p4 = pnand %p2211_p3, %p2205_p0 }
   0x9   :  { %2215 = shalt.err (!%p2212_p4)
}
   0xa   :  { %s2242_s19 = smov [#allocation2]  }
   0xb   :  { %26 = dma.vmem_to_smem %s24_s17, 16, %s2242_s19, [#allocation4]  }
   0xc   :  { %2238 = dma.done.wait [#allocation4], 16  }
   0xd   :  { %2239 = vsyncadd [#allocation4], 4294967280 }
   0xe   :  { %30 = sfence }
   0xf   :  { %v2277_v0 = vld [vmem:[%s3122_s0] sm:$0xff]  ;;  %vm53_vm0 = vcmask 392192   ;;  %v2282_v1 = vld [vmem:[%s3122_s0 + $0x10] sm:$0xff]  ;;  %v2287_v2 = vld [vmem:[%s3122_s0 + $0x8] sm:$0xff]  ;;  %vm114_vm1 = vcmask 386048   ;;  %vm2244_vm2 = vmmov 0  }
  0x10   :  { %v54_v3 = vsel %vm53_vm0, %v2277_v0, 0.0  ;;  %v60_v4 = vsel %vm53_vm0, %v2282_v1, 0.0  ;;  %v2296_v5 = vld [vmem:[%s3122_s0 + $0x18] sm:$0xff]  ;;  %v2301_v6 = vld [vmem:[%s3122_s0 + $0x28] sm:$0xff]  ;;  %v57_v7 = vsel %vm53_vm0, %v2287_v2, 0.0  ;;  %v2310_v9 = vld [vmem:[%s3122_s0 + $0x20] sm:$0xff] }
  0x11   :  { %55 = vadd.xlane.f32.xlu0 %v54_v3  ;;  %61 = vadd.xlane.f32.xlu1 %v60_v4  ;;  %v63_v8 = vsel %vm53_vm0, %v2296_v5, 0.0  ;;  %v2315_v10 = vld [vmem:[%s3122_s0 + $0x38] sm:$0xff]  ;;  %v2320_v11 = vld [vmem:[%s3122_s0 + $0x30] sm:$0xff]  ;;  %v2325_v12 = vld [vmem:[%s3122_s0 + $0x48] sm:$0xff]  ;;  %v69_v14 = vsel %vm53_vm0, %v2301_v6, 0.0  ;;  %v66_v15 = vsel %vm53_vm0, %v2310_v9, 0.0 }
  0x12   :  { %v2330_v13 = vld [vmem:[%s3122_s0 + $0x40] sm:$0xff]  ;;  %v75_v16 = vsel %vm53_vm0, %v2315_v10, 0.0  ;;  %v72_v17 = vsel %vm53_vm0, %v2320_v11, 0.0  ;;  %v81_v18 = vsel %vm53_vm0, %v2325_v12, 0.0  ;;  %v2347_v20 = vld [vmem:[%s3122_s0 + $0x58] sm:$0xff]  ;;  %v2352_v21 = vld [vmem:[%s3122_s0 + $0x50] sm:$0xff] }
  0x13   :  { %v78_v19 = vsel %vm53_vm0, %v2330_v13, 0.0  ;;  %v87_v22 = vsel %vm53_vm0, %v2347_v20, 0.0  ;;  %v84_v23 = vsel %vm53_vm0, %v2352_v21, 0.0  ;;  %v2361_v24 = vld [vmem:[%s3122_s0 + $0x68] sm:$0xff]  ;;  %v2366_v25 = vld [vmem:[%s3122_s0 + $0x60] sm:$0xff]  ;;  %v2375_v28 = vld [vmem:[%s3122_s0 + $0x78] sm:$0xff] }
  0x14   :  { %v93_v26 = vsel %vm53_vm0, %v2361_v24, 0.0  ;;  %v90_v27 = vsel %vm53_vm0, %v2366_v25, 0.0  ;;  %v2380_v29 = vld [vmem:[%s3122_s0 + $0x70] sm:$0xff]  ;;  %v99_v30 = vsel %vm53_vm0, %v2375_v28, 0.0  ;;  %v2389_v32 = vld [vmem:[%s3122_s0 + $0x88] sm:$0xff]  ;;  %v2394_v33 = vld [vmem:[%s3122_s0 + $0x80] sm:$0xff] }
  0x15   :  { %58 = vadd.xlane.f32.xlu0 %v57_v7  ;;  %64 = vadd.xlane.f32.xlu1 %v63_v8  ;;  %v96_v31 = vsel %vm53_vm0, %v2380_v29, 0.0  ;;  %v105_v34 = vsel %vm53_vm0, %v2389_v32, 0.0  ;;  %v102_v35 = vsel %vm53_vm0, %v2394_v33, 0.0  ;;  %v2403_v36 = vld [vmem:[%s3122_s0 + $0x98] sm:$0xff]  ;;  %v2408_v37 = vld [vmem:[%s3122_s0 + $0x90] sm:$0xff]  ;;  %vm598_vm3 = vcmask 130048  }
  0x16   :  { %v111_v38 = vsel %vm53_vm0, %v2403_v36, 0.0  ;;  %v108_v39 = vsel %vm53_vm0, %v2408_v37, 0.0  ;;  %v2423_v48 = vld [vmem:[%s3122_s0 + $0xa0] sm:$0x3]  ;;  %s752_s22 = sld [smem:[#allocation2]]  ;;  %s1828_s27 = sld [smem:[#allocation2 + $0x1]] }
  0x17   :  { %v115_v56 = vsel %vm114_vm1, %v2423_v48, 0.0  ;;  %s1835_s9 = sld [smem:[#allocation2 + $0x2]]  ;;  %s1848_s16 = sld [smem:[#allocation2 + $0x3]] }
  0x18   :  { %s1860_s29 = sld [smem:[#allocation2 + $0x5]]  ;;  %s2245_s7 = smov [#allocation5]  }
  0x19   :  { %70 = vadd.xlane.f32.xlu1 %v69_v14  ;;  %67 = vadd.xlane.f32.xlu0 %v66_v15  ;;  %s1776_s0 = sshll.u32 %s2245_s7, 4  ;;  %s1777_s0 = int_to_ptr.vmem [resolvable:$true] %s1776_s0 }
  0x1a   :  { %s2216_s8 = scalar_lea.vmem %s1777_s0, 32  ;;  %p2221_p6 = scmp.lt.s32.totalorder %s1777_s0, %s1777_s0 }
  0x1b   :  { %p2217_p5 = scmp.ne.s32.totalorder %s1777_s0, %s2216_s8  ;;  %p2222_p7 = scmp.lt.s32.totalorder %s2216_s8, %s2216_s8 }
  0x1d   :  { %76 = vadd.xlane.f32.xlu1 %v75_v16  ;;  %73 = vadd.xlane.f32.xlu0 %v72_v17  ;;  %p2223_p8 = por %p2222_p7, %p2221_p6 }
  0x1f   :  { %p2224_p9 = pnand %p2223_p8, %p2217_p5 }
  0x21   :  { %82 = vadd.xlane.f32.xlu1 %v81_v18  ;;  %79 = vadd.xlane.f32.xlu0 %v78_v19 }
  0x25   :  { %88 = vadd.xlane.f32.xlu1 %v87_v22  ;;  %85 = vadd.xlane.f32.xlu0 %v84_v23 }
  0x29   :  { %94 = vadd.xlane.f32.xlu1 %v93_v26  ;;  %91 = vadd.xlane.f32.xlu0 %v90_v27 }
  0x2d   :  { %100 = vadd.xlane.f32.xlu1 %v99_v30  ;;  %97 = vadd.xlane.f32.xlu0 %v96_v31 }
  0x31   :  { %106 = vadd.xlane.f32.xlu1 %v105_v34  ;;  %103 = vadd.xlane.f32.xlu0 %v102_v35 }
  0x35   :  { %112 = vadd.xlane.f32.xlu1 %v111_v38  ;;  %109 = vadd.xlane.f32.xlu0 %v108_v39 }
  0x9e   :  { %v56_v40 = vpop.xlane.xlu0 %55  ;;  %v62_v41 = vpop.xlane.xlu1 %61 }
  0x9f   :  { %v119_v42 = vmul.f32 0.020833334, %v56_v40  ;;  %v121_v43 = vmul.f32 0.020833334, %v62_v41 }
  0xa1   :  { %v2415_v44 = vsub.f32 %v2277_v0, %v119_v42  ;;  %v2418_v45 = vsub.f32 %v2282_v1, %v121_v43 }
  0xa2   :  { %v59_v46 = vpop.xlane.xlu0 %58  ;;  %v65_v47 = vpop.xlane.xlu1 %64 }
  0xa3   :  { %v120_v49 = vmul.f32 0.020833334, %v59_v46  ;;  %v122_v50 = vmul.f32 0.020833334, %v65_v47  ;;  %v161_v51 = vmul.f32 %v2415_v44, %v2415_v44  ;;  %v163_v58 = vmul.f32 %v2418_v45, %v2418_v45 }
  0xa5   :  { %v2428_v52 = vsub.f32 %v2287_v2, %v120_v49  ;;  %v2431_v53 = vsub.f32 %v2296_v5, %v122_v50  ;;  %v182_v54 = vsel %vm53_vm0, %v161_v51, 0.0  ;;  %v188_v4 = vsel %vm53_vm0, %v163_v58, 0.0 }
  0xa6   :  { %183 = vadd.xlane.f32.xlu0 %v182_v54  ;;  %v71_v55 = vpop.xlane.xlu1 %70  ;;  %v68_v57 = vpop.xlane.xlu0 %67 }
  0xa7   :  { %v124_v59 = vmul.f32 0.020833334, %v71_v55  ;;  %v162_v60 = vmul.f32 %v2428_v52, %v2428_v52  ;;  %v123_v61 = vmul.f32 0.020833334, %v68_v57  ;;  %v164_v62 = vmul.f32 %v2431_v53, %v2431_v53 }
  0xa9   :  { %v2443_v63 = vsub.f32 %v2301_v6, %v124_v59  ;;  %v185_v0 = vsel %vm53_vm0, %v162_v60, 0.0  ;;  %v2447_v1 = vsub.f32 %v2310_v9, %v123_v61  ;;  %v191_v3 = vsel %vm53_vm0, %v164_v62, 0.0 }
  0xaa   :  { %116 = vadd.xlane.f32.xlu0 %v115_v56  ;;  %186 = vadd.xlane.f32.xlu1 %v185_v0  ;;  %v77_v2 = vpop.xlane.xlu1 %76  ;;  %v74_v5 = vpop.xlane.xlu0 %73 }
  0xab   :  { %v126_v7 = vmul.f32 0.020833334, %v77_v2  ;;  %v125_v8 = vmul.f32 0.020833334, %v74_v5  ;;  %v166_v14 = vmul.f32 %v2443_v63, %v2443_v63  ;;  %v165_v6 = vmul.f32 %v2447_v1, %v2447_v1 }
  0xad   :  { %v2456_v15 = vsub.f32 %v2315_v10, %v126_v7  ;;  %v2459_v9 = vsub.f32 %v2320_v11, %v125_v8  ;;  %v197_v17 = vsel %vm53_vm0, %v166_v14, 0.0  ;;  %v194_v18 = vsel %vm53_vm0, %v165_v6, 0.0 }
  0xae   :  { %192 = vadd.xlane.f32.xlu0 %v191_v3  ;;  %189 = vadd.xlane.f32.xlu1 %v188_v4  ;;  %v83_v16 = vpop.xlane.xlu1 %82  ;;  %v80_v19 = vpop.xlane.xlu0 %79 }
  0xaf   :  { %v128_v22 = vmul.f32 0.020833334, %v83_v16  ;;  %v127_v23 = vmul.f32 0.020833334, %v80_v19  ;;  %v168_v26 = vmul.f32 %v2456_v15, %v2456_v15  ;;  %v167_v10 = vmul.f32 %v2459_v9, %v2459_v9 }
  0xb1   :  { %v2468_v27 = vsub.f32 %v2325_v12, %v128_v22  ;;  %v2471_v11 = vsub.f32 %v2330_v13, %v127_v23  ;;  %v203_v31 = vsel %vm53_vm0, %v168_v26, 0.0  ;;  %v200_v34 = vsel %vm53_vm0, %v167_v10, 0.0 }
  0xb2   :  { %198 = vadd.xlane.f32.xlu0 %v197_v17  ;;  %195 = vadd.xlane.f32.xlu1 %v194_v18  ;;  %v89_v30 = vpop.xlane.xlu1 %88  ;;  %v86_v35 = vpop.xlane.xlu0 %85 }
  0xb3   :  { %v130_v38 = vmul.f32 0.020833334, %v89_v30  ;;  %v129_v39 = vmul.f32 0.020833334, %v86_v35  ;;  %v170_v40 = vmul.f32 %v2468_v27, %v2468_v27  ;;  %v169_v12 = vmul.f32 %v2471_v11, %v2471_v11 }
  0xb4   :  { %v2243_v30 = vmov 0.0  }
  0xb5   :  { %v2480_v41 = vsub.f32 %v2347_v20, %v130_v38  ;;  %v2483_v13 = vsub.f32 %v2352_v21, %v129_v39  ;;  %v209_v43 = vsel %vm53_vm0, %v170_v40, 0.0  ;;  %v206_v46 = vsel %vm53_vm0, %v169_v12, 0.0  ;;  %1930 = vmatprep.subr.bf16.mxu0 %v2243_v30  ;;  %1980 = vmatprep.subr.bf16.mxu1 %v2243_v30  ;;  %v2149_v40 = vld [vmem:[%s3123_s1 + $0x10] sm:$0xff]  }
  0xb6   :  { %204 = vadd.xlane.f32.xlu0 %v203_v31  ;;  %201 = vadd.xlane.f32.xlu1 %v200_v34  ;;  %v95_v42 = vpop.xlane.xlu1 %94  ;;  %v92_v47 = vpop.xlane.xlu0 %91 }
  0xb7   :  { %v132_v49 = vmul.f32 0.020833334, %v95_v42  ;;  %v131_v50 = vmul.f32 0.020833334, %v92_v47  ;;  %v172_v51 = vmul.f32 %v2480_v41, %v2480_v41  ;;  %v171_v20 = vmul.f32 %v2483_v13, %v2483_v13  ;;  %1936 = vmatprep.mubr.msk.bf16.mxu0 %vm2244_vm2, %v2243_v30  ;;  %1982 = vmatprep.mubr.msk.bf16.mxu1 %vm2244_vm2, %v2243_v30 }
  0xb9   :  { %v2492_v54 = vsub.f32 %v2361_v24, %v132_v49  ;;  %v2495_v21 = vsub.f32 %v2366_v25, %v131_v50  ;;  %v215_v56 = vsel %vm53_vm0, %v172_v51, 0.0  ;;  %v212_v57 = vsel %vm53_vm0, %v171_v20, 0.0 }
  0xba   :  { %210 = vadd.xlane.f32.xlu0 %v209_v43  ;;  %207 = vadd.xlane.f32.xlu1 %v206_v46  ;;  %v101_v55 = vpop.xlane.xlu1 %100  ;;  %v98_v58 = vpop.xlane.xlu0 %97 }
  0xbb   :  { %v134_v59 = vmul.f32 0.020833334, %v101_v55  ;;  %v133_v60 = vmul.f32 0.020833334, %v98_v58  ;;  %v174_v61 = vmul.f32 %v2492_v54, %v2492_v54  ;;  %v173_v24 = vmul.f32 %v2495_v21, %v2495_v21 }
  0xbd   :  { %v2504_v62 = vsub.f32 %v2375_v28, %v134_v59  ;;  %v2507_v25 = vsub.f32 %v2380_v29, %v133_v60  ;;  %v221_v2 = vsel %vm53_vm0, %v174_v61, 0.0  ;;  %v218_v3 = vsel %vm53_vm0, %v173_v24, 0.0 }
  0xbe   :  { %216 = vadd.xlane.f32.xlu0 %v215_v56  ;;  %213 = vadd.xlane.f32.xlu1 %v212_v57  ;;  %v107_v0 = vpop.xlane.xlu1 %106  ;;  %v104_v4 = vpop.xlane.xlu0 %103 }
  0xbf   :  { %v136_v5 = vmul.f32 0.020833334, %v107_v0  ;;  %v135_v7 = vmul.f32 0.020833334, %v104_v4  ;;  %v176_v8 = vmul.f32 %v2504_v62, %v2504_v62  ;;  %v175_v28 = vmul.f32 %v2507_v25, %v2507_v25 }
  0xc1   :  { %v2516_v14 = vsub.f32 %v2389_v32, %v136_v5  ;;  %v2519_v29 = vsub.f32 %v2394_v33, %v135_v7  ;;  %v227_v16 = vsel %vm53_vm0, %v176_v8, 0.0  ;;  %v224_v17 = vsel %vm53_vm0, %v175_v28, 0.0  ;;  %v2147_v33 = vld [vmem:[%s3123_s1] sm:$0xff]  }
  0xc2   :  { %222 = vadd.xlane.f32.xlu0 %v221_v2  ;;  %219 = vadd.xlane.f32.xlu1 %v218_v3  ;;  %v113_v6 = vpop.xlane.xlu1 %112  ;;  %v110_v18 = vpop.xlane.xlu0 %109 }
  0xc3   :  { %v138_v19 = vmul.f32 0.020833334, %v113_v6  ;;  %v137_v22 = vmul.f32 0.020833334, %v110_v18  ;;  %v178_v23 = vmul.f32 %v2516_v14, %v2516_v14  ;;  %v177_v32 = vmul.f32 %v2519_v29, %v2519_v29  ;;  %1931 = vmatpush3.bf16.msra.mxu0 %v2147_v33 }
  0xc4   :  { %1932 = vmatprep.subr.bf16.mxu0 %v2243_v30 }
  0xc5   :  { %v2531_v26 = vsub.f32 %v2403_v36, %v138_v19  ;;  %v2534_v10 = vsub.f32 %v2408_v37, %v137_v22  ;;  %v233_v31 = vsel %vm53_vm0, %v178_v23, 0.0  ;;  %v230_v34 = vsel %vm53_vm0, %v177_v32, 0.0  ;;  %v2148_v37 = vld [vmem:[%s3123_s1 + $0x8] sm:$0xff]  }
  0xc6   :  { %228 = vadd.xlane.f32.xlu0 %v227_v16  ;;  %225 = vadd.xlane.f32.xlu1 %v224_v17  ;;  %v2568_v16 = vld [vmem:[%s3124_s2] ss:$0 sm:$0xff] }
  0xc7   :  { %v180_v35 = vmul.f32 %v2531_v26, %v2531_v26  ;;  %v179_v36 = vmul.f32 %v2534_v10, %v2534_v10  ;;  %1933 = vmatpush3.bf16.msra.mxu0 %v2148_v37 }
  0xc8   :  { %1934 = vmatprep.subr.bf16.mxu0 %v2243_v30 }
  0xc9   :  { %v239_v38 = vsel %vm53_vm0, %v180_v35, 0.0  ;;  %v236_v39 = vsel %vm53_vm0, %v179_v36, 0.0 }
  0xca   :  { %234 = vadd.xlane.f32.xlu0 %v233_v31  ;;  %231 = vadd.xlane.f32.xlu1 %v230_v34 }
  0xcb   :  { %1935 = vmatpush3.bf16.msra.mxu0 %v2149_v40 }
  0xce   :  { %240 = vadd.xlane.f32.xlu0 %v239_v38  ;;  %237 = vadd.xlane.f32.xlu1 %v236_v39 }
 0x133   :  { %v184_v12 = vpop.xlane.xlu0 %183 }
 0x134   :  { %v245_v42 = vmul.f32 0.020833334, %v184_v12 }
 0x136   :  { %v266_v43 = vadd.f32 1e-05, %v245_v42 }
 0x137   :  { %v187_v46 = vpop.xlane.xlu1 %186  ;;  %v117_v47 = vpop.xlane.xlu0 %116 }
 0x138   :  { %2162 = vrsqrt.f32 %v266_v43  ;;  %v246_v49 = vmul.f32 0.020833334, %v187_v46  ;;  %v139_v50 = vmul.f32 0.020833334, %v117_v47 }
 0x13a   :  { %v267_v51 = vadd.f32 1e-05, %v246_v49  ;;  %v2559_v20 = vsub.f32 %v2423_v48, %v139_v50 }
 0x13b   :  { %v190_v55 = vpop.xlane.xlu1 %189  ;;  %v193_v56 = vpop.xlane.xlu0 %192 }
 0x13c   :  { %2164 = vrsqrt.f32 %v267_v51  ;;  %v247_v57 = vmul.f32 0.020833334, %v190_v55  ;;  %v248_v58 = vmul.f32 0.020833334, %v193_v56  ;;  %v181_v59 = vmul.f32 %v2559_v20, %v2559_v20 }
 0x13e   :  { %v268_v60 = vadd.f32 1e-05, %v247_v57  ;;  %v269_v61 = vadd.f32 1e-05, %v248_v58  ;;  %v242_v24 = vsel %vm114_vm1, %v181_v59, 0.0 }
 0x13f   :  { %v196_v0 = vpop.xlane.xlu1 %195  ;;  %243 = vadd.xlane.f32.xlu1 %v242_v24  ;;  %v199_v2 = vpop.xlane.xlu0 %198 }
 0x140   :  { %2166 = vrsqrt.f32 %v268_v60  ;;  %v249_v3 = vmul.f32 0.020833334, %v196_v0  ;;  %v250_v4 = vmul.f32 0.020833334, %v199_v2 }
 0x141   :  { %2168 = vrsqrt.f32 %v269_v61 }
 0x142   :  { %v2163_v48 = vpop.eup %2162  ;;  %v270_v5 = vadd.f32 1e-05, %v249_v3  ;;  %v271_v7 = vadd.f32 1e-05, %v250_v4 }
 0x143   :  { %v308_v8 = vmul.f32 %v2163_v48, %v2415_v44  ;;  %v202_v28 = vpop.xlane.xlu1 %201  ;;  %v205_v6 = vpop.xlane.xlu0 %204  ;;  %v2575_v44 = vld [vmem:[%s3124_s2 + $0x1] ss:$0 sm:$0xff] }
 0x144   :  { %2170 = vrsqrt.f32 %v270_v5  ;;  %v251_v17 = vmul.f32 0.020833334, %v202_v28  ;;  %v252_v18 = vmul.f32 0.020833334, %v205_v6 }
 0x145   :  { %2172 = vrsqrt.f32 %v271_v7  ;;  %v334_v22 = vmul.f32 %v2568_v16, %v308_v8 }
 0x146   :  { %v2165_v19 = vpop.eup %2164  ;;  %v272_v32 = vadd.f32 1e-05, %v251_v17  ;;  %v273_v33 = vadd.f32 1e-05, %v252_v18 }
 0x147   :  { %v309_v23 = vmul.f32 %v2165_v19, %v2428_v52  ;;  %v208_v31 = vpop.xlane.xlu1 %207  ;;  %v211_v34 = vpop.xlane.xlu0 %210  ;;  %v360_v37 = vadd.f32 %v2575_v44, %v334_v22 }
 0x148   :  { %2174 = vrsqrt.f32 %v272_v32  ;;  %v253_v40 = vmul.f32 0.020833334, %v208_v31  ;;  %v254_v42 = vmul.f32 0.020833334, %v211_v34 }
 0x149   :  { %v335_v35 = vmul.f32 %v2568_v16, %v309_v23  ;;  %2176 = vrsqrt.f32 %v273_v33 }
 0x14a   :  { %v2167_v36 = vpop.eup %2166  ;;  %v274_v51 = vadd.f32 1e-05, %v253_v40  ;;  %v275_v55 = vadd.f32 1e-05, %v254_v42 }
 0x14b   :  { %v2169_v38 = vpop.eup %2168  ;;  %v310_v39 = vmul.f32 %v2167_v36, %v2418_v45  ;;  %v361_v52 = vadd.f32 %v2575_v44, %v335_v35  ;;  %v214_v45 = vpop.xlane.xlu1 %213 }
 0x14c   :  { %v311_v12 = vmul.f32 %v2169_v38, %v2431_v53  ;;  %v217_v57 = vpop.xlane.xlu0 %216  ;;  %2178 = vrsqrt.f32 %v274_v51  ;;  %v255_v60 = vmul.f32 0.020833334, %v214_v45 }
 0x14d   :  { %v381_v43 = vpack.c.bf16 %v361_v52, %v360_v37  ;;  %v336_v46 = vmul.f32 %v2568_v16, %v310_v39  ;;  %2180 = vrsqrt.f32 %v275_v55  ;;  %v256_v61 = vmul.f32 0.020833334, %v217_v57 }
 0x14e   :  { %v2171_v47 = vpop.eup %2170  ;;  %v337_v49 = vmul.f32 %v2568_v16, %v311_v12  ;;  %v276_v48 = vadd.f32 1e-05, %v255_v60 }
 0x14f   :  { %v2173_v50 = vpop.eup %2172  ;;  %1937 = vmatmul.mubr.msk.bf16.vlgmr.msra.gmra.mrb[0].mxu0 %vm53_vm0, %v381_v43  ;;  %v312_v56 = vmul.f32 %v2171_v47, %v2447_v1  ;;  %v362_v58 = vadd.f32 %v2575_v44, %v336_v46  ;;  %v220_v1 = vpop.xlane.xlu1 %219 }
 0x150   :  { %1940 = vmatprep.mubr.msk.bf16.mxu0 %vm2244_vm2, %v2243_v30  ;;  %v313_v53 = vmul.f32 %v2173_v50, %v2443_v63  ;;  %v363_v59 = vadd.f32 %v2575_v44, %v337_v49  ;;  %v277_v63 = vadd.f32 1e-05, %v256_v61  ;;  %v223_v8 = vpop.xlane.xlu0 %222  ;;  %2182 = vrsqrt.f32 %v276_v48 }
 0x151   :  { %v338_v2 = vmul.f32 %v2568_v16, %v312_v56  ;;  %v257_v17 = vmul.f32 0.020833334, %v220_v1  ;;  %v258_v18 = vmul.f32 0.020833334, %v223_v8 }
 0x152   :  { %v2175_v24 = vpop.eup %2174  ;;  %v382_v0 = vpack.c.bf16 %v363_v59, %v362_v58  ;;  %v339_v3 = vmul.f32 %v2568_v16, %v313_v53  ;;  %2184 = vrsqrt.f32 %v277_v63 }
 0x153   :  { %v2177_v4 = vpop.eup %2176  ;;  %v314_v5 = vmul.f32 %v2175_v24, %v2459_v9  ;;  %v364_v28 = vadd.f32 %v2575_v44, %v338_v2  ;;  %v278_v31 = vadd.f32 1e-05, %v257_v17  ;;  %v226_v9 = vpop.xlane.xlu1 %225 }
 0x154   :  { %v315_v7 = vmul.f32 %v2177_v4, %v2456_v15  ;;  %v365_v6 = vadd.f32 %v2575_v44, %v339_v3  ;;  %v279_v15 = vadd.f32 1e-05, %v258_v18  ;;  %v229_v36 = vpop.xlane.xlu0 %228  ;;  %v259_v39 = vmul.f32 0.020833334, %v226_v9 }
 0x155   :  { %v340_v23 = vmul.f32 %v2568_v16, %v314_v5  ;;  %2186 = vrsqrt.f32 %v278_v31  ;;  %v260_v40 = vmul.f32 0.020833334, %v229_v36 }
 0x156   :  { %v2179_v19 = vpop.eup %2178  ;;  %v383_v22 = vpack.c.bf16 %v365_v6, %v364_v28  ;;  %v341_v32 = vmul.f32 %v2568_v16, %v315_v7  ;;  %2188 = vrsqrt.f32 %v279_v15  ;;  %v280_v47 = vadd.f32 1e-05, %v259_v39 }
 0x157   :  { %1941 = vmatmul.mubr.msk.bf16.gmra.mrb[4].mxu0 %vm53_vm0, %v382_v0  ;;  %v2181_v33 = vpop.eup %2180  ;;  %v316_v34 = vmul.f32 %v2179_v19, %v2471_v11  ;;  %v366_v37 = vadd.f32 %v2575_v44, %v340_v23  ;;  %v232_v11 = vpop.xlane.xlu1 %231 }
 0x158   :  { %1944 = vmatprep.mubr.msk.bf16.mxu0 %vm2244_vm2, %v2243_v30  ;;  %v317_v35 = vmul.f32 %v2181_v33, %v2468_v27  ;;  %v367_v38 = vadd.f32 %v2575_v44, %v341_v32  ;;  %v281_v27 = vadd.f32 1e-05, %v260_v40  ;;  %v235_v51 = vpop.xlane.xlu0 %234  ;;  %2190 = vrsqrt.f32 %v280_v47 }
 0x159   :  { %v342_v42 = vmul.f32 %v2568_v16, %v316_v34  ;;  %v261_v56 = vmul.f32 0.020833334, %v232_v11  ;;  %v262_v53 = vmul.f32 0.020833334, %v235_v51 }
 0x15a   :  { %v2183_v52 = vpop.eup %2182  ;;  %v384_v12 = vpack.c.bf16 %v367_v38, %v366_v37  ;;  %v343_v43 = vmul.f32 %v2568_v16, %v317_v35  ;;  %2192 = vrsqrt.f32 %v281_v27 }
 0x15b   :  { %v318_v49 = vmul.f32 %v2183_v52, %v2483_v13  ;;  %v368_v55 = vadd.f32 %v2575_v44, %v342_v42  ;;  %v282_v24 = vadd.f32 1e-05, %v261_v56  ;;  %v238_v13 = vpop.xlane.xlu1 %237 }
 0x15c   :  { %v2185_v46 = vpop.eup %2184  ;;  %v369_v45 = vadd.f32 %v2575_v44, %v343_v43  ;;  %v241_v3 = vpop.xlane.xlu0 %240  ;;  %v263_v63 = vmul.f32 0.020833334, %v238_v13 }
 0x15d   :  { %v319_v50 = vmul.f32 %v2185_v46, %v2480_v41  ;;  %v344_v59 = vmul.f32 %v2568_v16, %v318_v49  ;;  %v283_v41 = vadd.f32 1e-05, %v262_v53  ;;  %2194 = vrsqrt.f32 %v282_v24  ;;  %v2675_v53 = vld [vmem:[%s3124_s2 + $0x2] ss:$0 sm:$0xff] }
 0x15e   :  { %v385_v58 = vpack.c.bf16 %v369_v45, %v368_v55  ;;  %v264_v1 = vmul.f32 0.020833334, %v241_v3  ;;  %v284_v17 = vadd.f32 1e-05, %v263_v63 }
 0x15f   :  { %1945 = vmatmul.mubr.msk.bf16.gmra.mrb[8].mxu0 %vm53_vm0, %v383_v22  ;;  %v2187_v57 = vpop.eup %2186  ;;  %v345_v60 = vmul.f32 %v2568_v16, %v319_v50  ;;  %v370_v4 = vadd.f32 %v2575_v44, %v344_v59  ;;  %2196 = vrsqrt.f32 %v283_v41 }
 0x160   :  { %1948 = vmatprep.mubr.msk.bf16.mxu0 %vm2244_vm2, %v2243_v30  ;;  %v2189_v61 = vpop.eup %2188  ;;  %v320_v0 = vmul.f32 %v2187_v57, %v2495_v21  ;;  %2198 = vrsqrt.f32 %v284_v17 }
 0x161   :  { %v321_v2 = vmul.f32 %v2189_v61, %v2492_v54  ;;  %v371_v48 = vadd.f32 %v2575_v44, %v345_v60  ;;  %v285_v54 = vadd.f32 1e-05, %v264_v1 }
 0x162   :  { %v2191_v5 = vpop.eup %2190  ;;  %v346_v8 = vmul.f32 %v2568_v16, %v320_v0 }
 0x163   :  { %v386_v7 = vpack.c.bf16 %v371_v48, %v370_v4  ;;  %v347_v28 = vmul.f32 %v2568_v16, %v321_v2  ;;  %v322_v21 = vmul.f32 %v2191_v5, %v2507_v25  ;;  %2200 = vrsqrt.f32 %v285_v54  ;;  %v2151_v54 = vld [vmem:[%s3123_s1 + $0x20] sm:$0xff]  }
 0x164   :  { %v2193_v6 = vpop.eup %2192  ;;  %v372_v19 = vadd.f32 %v2575_v44, %v346_v8 }
 0x165   :  { %v323_v18 = vmul.f32 %v2193_v6, %v2504_v62  ;;  %v373_v22 = vadd.f32 %v2575_v44, %v347_v28  ;;  %v348_v33 = vmul.f32 %v2568_v16, %v322_v21 }
 0x167   :  { %1949 = vmatmul.mubr.msk.bf16.gmra.mrb[12].mxu0 %vm53_vm0, %v384_v12  ;;  %v2195_v23 = vpop.eup %2194  ;;  %v387_v32 = vpack.c.bf16 %v373_v22, %v372_v19  ;;  %v349_v31 = vmul.f32 %v2568_v16, %v323_v18  ;;  %v374_v9 = vadd.f32 %v2575_v44, %v348_v33 }
 0x168   :  { %1952 = vmatprep.mubr.msk.bf16.mxu0 %vm2244_vm2, %v2243_v30  ;;  %v324_v62 = vmul.f32 %v2195_v23, %v2519_v29 }
 0x169   :  { %v2197_v15 = vpop.eup %2196  ;;  %v375_v34 = vadd.f32 %v2575_v44, %v349_v31 }
 0x16a   :  { %v325_v25 = vmul.f32 %v2197_v15, %v2516_v14  ;;  %v2199_v35 = vpop.eup %2198  ;;  %v350_v37 = vmul.f32 %v2568_v16, %v324_v62 }
 0x16b   :  { %v388_v36 = vpack.c.bf16 %v375_v34, %v374_v9  ;;  %v326_v29 = vmul.f32 %v2199_v35, %v2534_v10 }
 0x16c   :  { %v351_v38 = vmul.f32 %v2568_v16, %v325_v25  ;;  %v376_v40 = vadd.f32 %v2575_v44, %v350_v37 }
 0x16d   :  { %v2201_v39 = vpop.eup %2200  ;;  %v352_v42 = vmul.f32 %v2568_v16, %v326_v29 }
 0x16e   :  { %v327_v14 = vmul.f32 %v2201_v39, %v2531_v26  ;;  %v377_v52 = vadd.f32 %v2575_v44, %v351_v38  ;;  %v2150_v26 = vld [vmem:[%s3123_s1 + $0x18] sm:$0xff]  }
 0x16f   :  { %1953 = vmatmul.mubr.msk.bf16.gmra.mrb[16].mxu0 %vm53_vm0, %v385_v58  ;;  %v378_v46 = vadd.f32 %v2575_v44, %v352_v42  ;;  %1981 = vmatpush3.bf16.msra.mxu1 %v2150_v26 }
 0x170   :  { %1956 = vmatprep.mubr.msk.bf16.mxu0 %vm2244_vm2, %v2243_v30  ;;  %v389_v12 = vpack.c.bf16 %v377_v52, %v376_v40  ;;  %v353_v43 = vmul.f32 %v2568_v16, %v327_v14  ;;  %2026 = vmatprep.subr.bf16.mxu1 %v2243_v30 }
 0x172   :  { %v379_v10 = vadd.f32 %v2575_v44, %v353_v43 }
 0x174   :  { %v390_v47 = vpack.c.bf16 %v379_v10, %v378_v46 }
 0x177   :  { %1957 = vmatmul.mubr.msk.bf16.gmra.mrb[20].mxu0 %vm53_vm0, %v386_v7 }
 0x178   :  { %1960 = vmatprep.mubr.msk.bf16.mxu0 %vm2244_vm2, %v2243_v30 }
 0x17f   :  { %1961 = vmatmul.mubr.msk.bf16.gmra.mrb[24].mxu0 %vm53_vm0, %v387_v32 }
 0x180   :  { %1964 = vmatprep.mubr.msk.bf16.mxu0 %vm2244_vm2, %v2243_v30 }
 0x187   :  { %1965 = vmatmul.mubr.msk.bf16.gmra.mrb[28].mxu0 %vm53_vm0, %v388_v36 }
 0x188   :  { %1968 = vmatprep.mubr.msk.bf16.mxu0 %vm2244_vm2, %v2243_v30 }
 0x18f   :  { %1969 = vmatmul.mubr.msk.bf16.gmra.mrb[32].mxu0 %vm53_vm0, %v389_v12 }
 0x190   :  { %1972 = vmatprep.mubr.msk.bf16.mxu0 %vm2244_vm2, %v2243_v30 }
 0x197   :  { %1973 = vmatmul.mubr.msk.bf16.gmra.mrb[36].mxu0 %vm53_vm0, %v390_v47 }
 0x198   :  { %1976 = vmatprep.mubr.msk.bf16.mxu0 %vm2244_vm2, %v2243_v30 }
 0x1cc   :  { %v244_v27 = vpop.xlane.xlu1 %243 }
 0x1cd   :  { %v265_v11 = vmul.f32 0.020833334, %v244_v27 }
 0x1cf   :  { %v286_v49 = vadd.f32 1e-05, %v265_v11 }
 0x1d1   :  { %2202 = vrsqrt.f32 %v286_v49 }
 0x1db   :  { %v2203_v50 = vpop.eup %2202 }
 0x1dc   :  { %v328_v51 = vmul.f32 %v2203_v50, %v2559_v20 }
 0x1de   :  { %v354_v55 = vmul.f32 %v2568_v16, %v328_v51 }
 0x1e0   :  { %v380_v45 = vadd.f32 %v2575_v44, %v354_v55 }
 0x1e2   :  { %v391_v56 = vpack.c.bf16 %v380_v45, %v380_v45 }
 0x1e4   :  { %1977 = vmatmul.mubr.msk.bf16.gmra.mrb[40].mxu0 %vm53_vm0, %v391_v56 }
 0x222   :  { %v488_v57 = vpop.f32.mrb[0].mxu0 }
 0x223   :  { %v1938_v58 = vpop.f32.mrb[1].mxu0  ;;  %v2678_v60 = vadd.f32 %v2675_v53, %v488_v57 }
 0x224   :  { %v491_v59 = vpop.f32.mrb[2].mxu0 }
 0x225   :  { %v2681_v20 = vadd.f32 %v2675_v53, %v491_v59  ;;  %v1939_v16 = vpop.f32.mrb[3].mxu0 }
 0x227   :  { %v574_v44 = vpack.c.bf16 %v2681_v20, %v2678_v60 }
 0x229   :  { %1983 = vmatmul.mubr.msk.bf16.vlgmr.msra.gmra.mrb[0].mxu1 %vm598_vm3, %v574_v44 }
 0x22a   :  { %v496_v61 = vpop.f32.mrb[4].mxu0  ;;  %1986 = vmatprep.mubr.msk.bf16.mxu1 %vm2244_vm2, %v2243_v30  ;;  %2027 = vmatpush3.bf16.msra.mxu1 %v2151_v54 }
 0x22b   :  { %v1942_v24 = vpop.f32.mrb[5].mxu0  ;;  %v2689_v13 = vadd.f32 %v2675_v53, %v496_v61 }
 0x22c   :  { %v499_v41 = vpop.f32.mrb[6].mxu0 }
 0x22d   :  { %v2692_v0 = vadd.f32 %v2675_v53, %v499_v41  ;;  %v1943_v2 = vpop.f32.mrb[7].mxu0 }
 0x22f   :  { %v575_v3 = vpack.c.bf16 %v2692_v0, %v2689_v13 }
 0x231   :  { %1987 = vmatmul.mubr.msk.bf16.gmra.mrb[4].mxu1 %vm598_vm3, %v575_v3 }
 0x232   :  { %v504_v4 = vpop.f32.mrb[8].mxu0  ;;  %1990 = vmatprep.mubr.msk.bf16.mxu1 %vm2244_vm2, %v2243_v30 }
 0x233   :  { %v1946_v48 = vpop.f32.mrb[9].mxu0  ;;  %v2700_v1 = vadd.f32 %v2675_v53, %v504_v4 }
 0x234   :  { %v507_v63 = vpop.f32.mrb[10].mxu0 }
 0x235   :  { %v2703_v5 = vadd.f32 %v2675_v53, %v507_v63  ;;  %v1947_v7 = vpop.f32.mrb[11].mxu0 }
 0x237   :  { %v576_v8 = vpack.c.bf16 %v2703_v5, %v2700_v1 }
 0x239   :  { %1991 = vmatmul.mubr.msk.bf16.gmra.mrb[8].mxu1 %vm598_vm3, %v576_v8 }
 0x23a   :  { %v512_v28 = vpop.f32.mrb[12].mxu0  ;;  %1994 = vmatprep.mubr.msk.bf16.mxu1 %vm2244_vm2, %v2243_v30 }
 0x23b   :  { %v1950_v6 = vpop.f32.mrb[13].mxu0  ;;  %v2714_v21 = vadd.f32 %v2675_v53, %v512_v28  ;;  %v2801_v28 = vld [vmem:[%s3124_s2 + $0x3] ss:$0 sm:$0xff] }
 0x23c   :  { %v515_v17 = vpop.f32.mrb[14].mxu0 }
 0x23d   :  { %v2717_v18 = vadd.f32 %v2675_v53, %v515_v17  ;;  %v1951_v19 = vpop.f32.mrb[15].mxu0 }
 0x23f   :  { %v577_v22 = vpack.c.bf16 %v2717_v18, %v2714_v21 }
 0x241   :  { %1995 = vmatmul.mubr.msk.bf16.gmra.mrb[12].mxu1 %vm598_vm3, %v577_v22 }
 0x242   :  { %v520_v23 = vpop.f32.mrb[16].mxu0  ;;  %1998 = vmatprep.mubr.msk.bf16.mxu1 %vm2244_vm2, %v2243_v30 }
 0x243   :  { %v1954_v32 = vpop.f32.mrb[17].mxu0  ;;  %v2725_v31 = vadd.f32 %v2675_v53, %v520_v23 }
 0x244   :  { %v523_v33 = vpop.f32.mrb[18].mxu0 }
 0x245   :  { %v2728_v15 = vadd.f32 %v2675_v53, %v523_v33  ;;  %v1955_v62 = vpop.f32.mrb[19].mxu0 }
 0x247   :  { %v578_v25 = vpack.c.bf16 %v2728_v15, %v2725_v31 }
 0x249   :  { %1999 = vmatmul.mubr.msk.bf16.gmra.mrb[16].mxu1 %vm598_vm3, %v578_v25 }
 0x24a   :  { %v528_v9 = vpop.f32.mrb[20].mxu0  ;;  %2002 = vmatprep.mubr.msk.bf16.mxu1 %vm2244_vm2, %v2243_v30 }
 0x24b   :  { %v1958_v34 = vpop.f32.mrb[21].mxu0  ;;  %v2736_v36 = vadd.f32 %v2675_v53, %v528_v9 }
 0x24c   :  { %v531_v35 = vpop.f32.mrb[22].mxu0 }
 0x24d   :  { %v2739_v37 = vadd.f32 %v2675_v53, %v531_v35  ;;  %v1959_v38 = vpop.f32.mrb[23].mxu0 }
 0x24f   :  { %v579_v39 = vpack.c.bf16 %v2739_v37, %v2736_v36 }
 0x251   :  { %2003 = vmatmul.mubr.msk.bf16.gmra.mrb[20].mxu1 %vm598_vm3, %v579_v39 }
 0x252   :  { %v536_v29 = vpop.f32.mrb[24].mxu0  ;;  %2006 = vmatprep.mubr.msk.bf16.mxu1 %vm2244_vm2, %v2243_v30 }
 0x253   :  { %v1962_v14 = vpop.f32.mrb[25].mxu0  ;;  %v2747_v52 = vadd.f32 %v2675_v53, %v536_v29 }
 0x254   :  { %v539_v40 = vpop.f32.mrb[26].mxu0 }
 0x255   :  { %v2750_v12 = vadd.f32 %v2675_v53, %v539_v40  ;;  %v1963_v42 = vpop.f32.mrb[27].mxu0 }
 0x257   :  { %v580_v43 = vpack.c.bf16 %v2750_v12, %v2747_v52 }
 0x259   :  { %2007 = vmatmul.mubr.msk.bf16.gmra.mrb[24].mxu1 %vm598_vm3, %v580_v43 }
 0x25a   :  { %v544_v46 = vpop.f32.mrb[28].mxu0  ;;  %2010 = vmatprep.mubr.msk.bf16.mxu1 %vm2244_vm2, %v2243_v30 }
 0x25b   :  { %v1966_v10 = vpop.f32.mrb[29].mxu0  ;;  %v2758_v26 = vadd.f32 %v2675_v53, %v544_v46 }
 0x25c   :  { %v547_v47 = vpop.f32.mrb[30].mxu0 }
 0x25d   :  { %v2761_v27 = vadd.f32 %v2675_v53, %v547_v47  ;;  %v1967_v11 = vpop.f32.mrb[31].mxu0 }
 0x25f   :  { %v581_v49 = vpack.c.bf16 %v2761_v27, %v2758_v26 }
 0x261   :  { %2011 = vmatmul.mubr.msk.bf16.gmra.mrb[28].mxu1 %vm598_vm3, %v581_v49 }
 0x262   :  { %v552_v50 = vpop.f32.mrb[32].mxu0  ;;  %2014 = vmatprep.mubr.msk.bf16.mxu1 %vm2244_vm2, %v2243_v30 }
 0x263   :  { %v1970_v51 = vpop.f32.mrb[33].mxu0  ;;  %v2769_v45 = vadd.f32 %v2675_v53, %v552_v50 }
 0x264   :  { %v555_v55 = vpop.f32.mrb[34].mxu0 }
 0x265   :  { %v2772_v56 = vadd.f32 %v2675_v53, %v555_v55  ;;  %v1971_v57 = vpop.f32.mrb[35].mxu0 }
 0x267   :  { %v582_v58 = vpack.c.bf16 %v2772_v56, %v2769_v45 }
 0x269   :  { %2015 = vmatmul.mubr.msk.bf16.gmra.mrb[32].mxu1 %vm598_vm3, %v582_v58 }
 0x26a   :  { %v560_v59 = vpop.f32.mrb[36].mxu0  ;;  %2018 = vmatprep.mubr.msk.bf16.mxu1 %vm2244_vm2, %v2243_v30 }
 0x26b   :  { %v1974_v16 = vpop.f32.mrb[37].mxu0  ;;  %v2780_v61 = vadd.f32 %v2675_v53, %v560_v59 }
 0x26c   :  { %v563_v44 = vpop.f32.mrb[38].mxu0 }
 0x26d   :  { %v2783_v24 = vadd.f32 %v2675_v53, %v563_v44  ;;  %v1975_v41 = vpop.f32.mrb[39].mxu0 }
 0x26f   :  { %v583_v2 = vpack.c.bf16 %v2783_v24, %v2780_v61 }
 0x271   :  { %2019 = vmatmul.mubr.msk.bf16.gmra.mrb[36].mxu1 %vm598_vm3, %v583_v2 }
 0x272   :  { %2022 = vmatprep.mubr.msk.bf16.mxu1 %vm2244_vm2, %v2243_v30 }
 0x2b7   :  { %v568_v3 = vpop.f32.mrb[40].mxu0 }
 0x2b8   :  { %v2791_v4 = vadd.f32 %v2675_v53, %v568_v3  ;;  %v1978_v48 = vpop.f32.mrb[41].mxu0  ;;  %v2803_v53 = vstv %s752_s22  ;;  %s1854_s22 = sld [smem:[#allocation2 + $0x4]] }
 0x2b9   :  { %v571_v63 = vpop.f32.mrb[42].mxu0 }
 0x2ba   :  { %v584_v7 = vpack.c.bf16 %v2791_v4, %v2791_v4  ;;  %v1979_v8 = vpop.f32.mrb[43].mxu0 }
 0x2bc   :  { %2023 = vmatmul.mubr.msk.bf16.gmra.mrb[40].mxu1 %vm598_vm3, %v584_v7 }
 0x2bd   :  { %2028 = vmatprep.mubr.msk.bf16.mxu1 %vm2244_vm2, %v2243_v30 }
 0x2fc   :  { %v666_v6 = vpop.f32.mrb[0].mxu1 }
 0x2fd   :  { %v667_v17 = vadd.f32 %v2801_v28, %v666_v6  ;;  %v1984_v54 = vpop.f32.mrb[1].mxu1 }
 0x2fe   :  { %v669_v19 = vpop.f32.mrb[2].mxu1 }
 0x2ff   :  { %v775_v22 = vmul.f32 %v2803_v53, %v667_v17  ;;  %v670_v23 = vadd.f32 %v2801_v28, %v669_v19  ;;  %v1985_v32 = vpop.f32.mrb[3].mxu1  ;;  %vm753_vm4 = vcmp.gt.f32.partialorder %v667_v17, 0.0 }
 0x301   :  { %vm754_vm5 = vcmp.gt.f32.partialorder %v670_v23, 0.0  ;;  %v776_v33 = vmul.f32 %v2803_v53, %v670_v23  ;;  %v796_v62 = vsel %vm753_vm4, %v667_v17, %v775_v22 }
 0x303   :  { %v797_v25 = vsel %vm754_vm5, %v670_v23, %v776_v33 }
 0x304   :  { %v817_v9 = vpack.c.bf16 %v797_v25, %v796_v62  ;;  %v674_v34 = vpop.f32.mrb[4].mxu1 }
 0x305   :  { %v675_v35 = vadd.f32 %v2801_v28, %v674_v34  ;;  %v1988_v38 = vpop.f32.mrb[5].mxu1 }
 0x306   :  { %v677_v39 = vpop.f32.mrb[6].mxu1  ;;  %2029 = vmatmul.mubr.msk.bf16.vlgmr.msra.gmra.mrb[44].mxu1 %vm598_vm3, %v817_v9 }
 0x307   :  { %v777_v29 = vmul.f32 %v2803_v53, %v675_v35  ;;  %v678_v14 = vadd.f32 %v2801_v28, %v677_v39  ;;  %v1989_v40 = vpop.f32.mrb[7].mxu1  ;;  %2032 = vmatprep.mubr.msk.bf16.mxu1 %vm2244_vm2, %v2243_v30  ;;  %vm755_vm6 = vcmp.gt.f32.partialorder %v675_v35, 0.0 }
 0x309   :  { %vm756_vm7 = vcmp.gt.f32.partialorder %v678_v14, 0.0  ;;  %v778_v42 = vmul.f32 %v2803_v53, %v678_v14  ;;  %v798_v43 = vsel %vm755_vm6, %v675_v35, %v777_v29 }
 0x30b   :  { %v799_v46 = vsel %vm756_vm7, %v678_v14, %v778_v42 }
 0x30c   :  { %v818_v10 = vpack.c.bf16 %v799_v46, %v798_v43  ;;  %v682_v47 = vpop.f32.mrb[8].mxu1 }
 0x30d   :  { %v683_v11 = vadd.f32 %v2801_v28, %v682_v47  ;;  %v1992_v49 = vpop.f32.mrb[9].mxu1 }
 0x30e   :  { %v685_v50 = vpop.f32.mrb[10].mxu1  ;;  %2033 = vmatmul.mubr.msk.bf16.gmra.mrb[48].mxu1 %vm598_vm3, %v818_v10 }
 0x30f   :  { %v779_v51 = vmul.f32 %v2803_v53, %v683_v11  ;;  %v686_v55 = vadd.f32 %v2801_v28, %v685_v50  ;;  %v1993_v57 = vpop.f32.mrb[11].mxu1  ;;  %2036 = vmatprep.mubr.msk.bf16.mxu1 %vm2244_vm2, %v2243_v30  ;;  %vm757_vm8 = vcmp.gt.f32.partialorder %v683_v11, 0.0 }
 0x311   :  { %vm758_vm9 = vcmp.gt.f32.partialorder %v686_v55, 0.0  ;;  %v780_v58 = vmul.f32 %v2803_v53, %v686_v55  ;;  %v800_v59 = vsel %vm757_vm8, %v683_v11, %v779_v51 }
 0x313   :  { %v801_v16 = vsel %vm758_vm9, %v686_v55, %v780_v58 }
 0x314   :  { %v819_v44 = vpack.c.bf16 %v801_v16, %v800_v59  ;;  %v690_v41 = vpop.f32.mrb[12].mxu1 }
 0x315   :  { %v691_v2 = vadd.f32 %v2801_v28, %v690_v41  ;;  %v1996_v3 = vpop.f32.mrb[13].mxu1 }
 0x316   :  { %v693_v48 = vpop.f32.mrb[14].mxu1  ;;  %2037 = vmatmul.mubr.msk.bf16.gmra.mrb[52].mxu1 %vm598_vm3, %v819_v44 }
 0x317   :  { %v781_v63 = vmul.f32 %v2803_v53, %v691_v2  ;;  %v694_v7 = vadd.f32 %v2801_v28, %v693_v48  ;;  %v1997_v8 = vpop.f32.mrb[15].mxu1  ;;  %2040 = vmatprep.mubr.msk.bf16.mxu1 %vm2244_vm2, %v2243_v30  ;;  %vm759_vm10 = vcmp.gt.f32.partialorder %v691_v2, 0.0 }
 0x319   :  { %vm760_vm11 = vcmp.gt.f32.partialorder %v694_v7, 0.0  ;;  %v782_v6 = vmul.f32 %v2803_v53, %v694_v7  ;;  %v802_v17 = vsel %vm759_vm10, %v691_v2, %v781_v63 }
 0x31b   :  { %v803_v54 = vsel %vm760_vm11, %v694_v7, %v782_v6 }
 0x31c   :  { %v820_v19 = vpack.c.bf16 %v803_v54, %v802_v17  ;;  %v698_v22 = vpop.f32.mrb[16].mxu1 }
 0x31d   :  { %v699_v23 = vadd.f32 %v2801_v28, %v698_v22  ;;  %v2000_v32 = vpop.f32.mrb[17].mxu1 }
 0x31e   :  { %v701_v33 = vpop.f32.mrb[18].mxu1  ;;  %2041 = vmatmul.mubr.msk.bf16.gmra.mrb[56].mxu1 %vm598_vm3, %v820_v19 }
 0x31f   :  { %v783_v62 = vmul.f32 %v2803_v53, %v699_v23  ;;  %v702_v25 = vadd.f32 %v2801_v28, %v701_v33  ;;  %v2001_v9 = vpop.f32.mrb[19].mxu1  ;;  %2044 = vmatprep.mubr.msk.bf16.mxu1 %vm2244_vm2, %v2243_v30  ;;  %vm761_vm12 = vcmp.gt.f32.partialorder %v699_v23, 0.0 }
 0x321   :  { %vm762_vm13 = vcmp.gt.f32.partialorder %v702_v25, 0.0  ;;  %v784_v34 = vmul.f32 %v2803_v53, %v702_v25  ;;  %v804_v35 = vsel %vm761_vm12, %v699_v23, %v783_v62 }
 0x323   :  { %v805_v38 = vsel %vm762_vm13, %v702_v25, %v784_v34 }
 0x324   :  { %v821_v39 = vpack.c.bf16 %v805_v38, %v804_v35  ;;  %v706_v29 = vpop.f32.mrb[20].mxu1 }
 0x325   :  { %v707_v14 = vadd.f32 %v2801_v28, %v706_v29  ;;  %v2004_v40 = vpop.f32.mrb[21].mxu1 }
 0x326   :  { %v709_v42 = vpop.f32.mrb[22].mxu1  ;;  %2045 = vmatmul.mubr.msk.bf16.gmra.mrb[60].mxu1 %vm598_vm3, %v821_v39 }
 0x327   :  { %v785_v43 = vmul.f32 %v2803_v53, %v707_v14  ;;  %v710_v46 = vadd.f32 %v2801_v28, %v709_v42  ;;  %v2005_v10 = vpop.f32.mrb[23].mxu1  ;;  %2048 = vmatprep.mubr.msk.bf16.mxu1 %vm2244_vm2, %v2243_v30  ;;  %vm763_vm14 = vcmp.gt.f32.partialorder %v707_v14, 0.0 }
 0x329   :  { %vm764_vm15 = vcmp.gt.f32.partialorder %v710_v46, 0.0  ;;  %v786_v47 = vmul.f32 %v2803_v53, %v710_v46  ;;  %v806_v11 = vsel %vm763_vm14, %v707_v14, %v785_v43  ;;  %vm1088_vm14 = vcmask 1041408  }
 0x32b   :  { %v807_v49 = vsel %vm764_vm15, %v710_v46, %v786_v47 }
 0x32c   :  { %v822_v50 = vpack.c.bf16 %v807_v49, %v806_v11  ;;  %v714_v51 = vpop.f32.mrb[24].mxu1 }
 0x32d   :  { %v715_v55 = vadd.f32 %v2801_v28, %v714_v51  ;;  %v2008_v57 = vpop.f32.mrb[25].mxu1 }
 0x32e   :  { %v717_v58 = vpop.f32.mrb[26].mxu1  ;;  %2049 = vmatmul.mubr.msk.bf16.gmra.mrb[64].mxu1 %vm598_vm3, %v822_v50 }
 0x32f   :  { %v787_v59 = vmul.f32 %v2803_v53, %v715_v55  ;;  %v718_v16 = vadd.f32 %v2801_v28, %v717_v58  ;;  %v2009_v44 = vpop.f32.mrb[27].mxu1  ;;  %2052 = vmatprep.mubr.msk.bf16.mxu1 %vm2244_vm2, %v2243_v30  ;;  %vm765_vm0 = vcmp.gt.f32.partialorder %v715_v55, 0.0 }
 0x331   :  { %vm766_vm1 = vcmp.gt.f32.partialorder %v718_v16, 0.0  ;;  %v788_v41 = vmul.f32 %v2803_v53, %v718_v16  ;;  %v808_v2 = vsel %vm765_vm0, %v715_v55, %v787_v59 }
 0x333   :  { %v809_v3 = vsel %vm766_vm1, %v718_v16, %v788_v41 }
 0x334   :  { %v823_v48 = vpack.c.bf16 %v809_v3, %v808_v2  ;;  %v722_v63 = vpop.f32.mrb[28].mxu1 }
 0x335   :  { %v723_v7 = vadd.f32 %v2801_v28, %v722_v63  ;;  %v2012_v8 = vpop.f32.mrb[29].mxu1 }
 0x336   :  { %v725_v6 = vpop.f32.mrb[30].mxu1  ;;  %2053 = vmatmul.mubr.msk.bf16.gmra.mrb[68].mxu1 %vm598_vm3, %v823_v48 }
 0x337   :  { %v789_v17 = vmul.f32 %v2803_v53, %v723_v7  ;;  %v726_v54 = vadd.f32 %v2801_v28, %v725_v6  ;;  %v2013_v19 = vpop.f32.mrb[31].mxu1  ;;  %2056 = vmatprep.mubr.msk.bf16.mxu1 %vm2244_vm2, %v2243_v30  ;;  %vm767_vm4 = vcmp.gt.f32.partialorder %v723_v7, 0.0 }
 0x339   :  { %vm768_vm5 = vcmp.gt.f32.partialorder %v726_v54, 0.0  ;;  %v790_v22 = vmul.f32 %v2803_v53, %v726_v54  ;;  %v810_v23 = vsel %vm767_vm4, %v723_v7, %v789_v17  ;;  %v2152_v7 = vld [vmem:[%s3123_s1 + $0x28] sm:$0xff]  }
 0x33a   :  { %2072 = vmatprep.subr.bf16.mxu0 %v2152_v7 }
 0x33b   :  { %v811_v32 = vsel %vm768_vm5, %v726_v54, %v790_v22  ;;  %2073 = vmatpush3.bf16.msra.mxu0 %v2152_v7 }
 0x33c   :  { %v824_v33 = vpack.c.bf16 %v811_v32, %v810_v23  ;;  %v730_v62 = vpop.f32.mrb[32].mxu1 }
 0x33d   :  { %v731_v25 = vadd.f32 %v2801_v28, %v730_v62  ;;  %v2016_v9 = vpop.f32.mrb[33].mxu1 }
 0x33e   :  { %v733_v34 = vpop.f32.mrb[34].mxu1  ;;  %2057 = vmatmul.mubr.msk.bf16.gmra.mrb[72].mxu1 %vm598_vm3, %v824_v33 }
 0x33f   :  { %v791_v35 = vmul.f32 %v2803_v53, %v731_v25  ;;  %v734_v38 = vadd.f32 %v2801_v28, %v733_v34  ;;  %v2017_v39 = vpop.f32.mrb[35].mxu1  ;;  %2060 = vmatprep.mubr.msk.bf16.mxu1 %vm2244_vm2, %v2243_v30  ;;  %vm769_vm6 = vcmp.gt.f32.partialorder %v731_v25, 0.0 }
 0x341   :  { %vm770_vm7 = vcmp.gt.f32.partialorder %v734_v38, 0.0  ;;  %v792_v29 = vmul.f32 %v2803_v53, %v734_v38  ;;  %v812_v14 = vsel %vm769_vm6, %v731_v25, %v791_v35  ;;  %v2886_v25 = vld [vmem:[%s3124_s2 + $0x4] ss:$0 sm:$0xff] }
 0x343   :  { %v813_v40 = vsel %vm770_vm7, %v734_v38, %v792_v29 }
 0x344   :  { %v825_v42 = vpack.c.bf16 %v813_v40, %v812_v14  ;;  %v738_v43 = vpop.f32.mrb[36].mxu1 }
 0x345   :  { %v739_v46 = vadd.f32 %v2801_v28, %v738_v43  ;;  %v2020_v10 = vpop.f32.mrb[37].mxu1  ;;  %v2893_v43 = vstv %s1828_s27 }
 0x346   :  { %v741_v47 = vpop.f32.mrb[38].mxu1  ;;  %2061 = vmatmul.mubr.msk.bf16.gmra.mrb[76].mxu1 %vm598_vm3, %v825_v42 }
 0x347   :  { %v793_v11 = vmul.f32 %v2803_v53, %v739_v46  ;;  %v742_v49 = vadd.f32 %v2801_v28, %v741_v47  ;;  %v2021_v50 = vpop.f32.mrb[39].mxu1  ;;  %2064 = vmatprep.mubr.msk.bf16.mxu1 %vm2244_vm2, %v2243_v30  ;;  %vm771_vm8 = vcmp.gt.f32.partialorder %v739_v46, 0.0 }
 0x349   :  { %vm772_vm9 = vcmp.gt.f32.partialorder %v742_v49, 0.0  ;;  %v794_v51 = vmul.f32 %v2803_v53, %v742_v49  ;;  %v814_v55 = vsel %vm771_vm8, %v739_v46, %v793_v11 }
 0x34b   :  { %v815_v57 = vsel %vm772_vm9, %v742_v49, %v794_v51 }
 0x34c   :  { %v826_v58 = vpack.c.bf16 %v815_v57, %v814_v55 }
 0x34e   :  { %2065 = vmatmul.mubr.msk.bf16.gmra.mrb[80].mxu1 %vm598_vm3, %v826_v58 }
 0x34f   :  { %2068 = vmatprep.mubr.msk.bf16.mxu1 %vm2244_vm2, %v2243_v30 }
 0x38f   :  { %v746_v59 = vpop.f32.mrb[40].mxu1 }
 0x390   :  { %v747_v16 = vadd.f32 %v2801_v28, %v746_v59  ;;  %v2024_v44 = vpop.f32.mrb[41].mxu1 }
 0x391   :  { %v749_v41 = vpop.f32.mrb[42].mxu1 }
 0x392   :  { %vm773_vm10 = vcmp.gt.f32.partialorder %v747_v16, 0.0  ;;  %v795_v2 = vmul.f32 %v2803_v53, %v747_v16  ;;  %v2025_v3 = vpop.f32.mrb[43].mxu1 }
 0x394   :  { %v816_v48 = vsel %vm773_vm10, %v747_v16, %v795_v2 }
 0x395   :  { %v827_v63 = vpack.c.bf16 %v816_v48, %v816_v48 }
 0x397   :  { %2069 = vmatmul.mubr.msk.bf16.gmra.mrb[84].mxu1 %vm598_vm3, %v827_v63 }
 0x3d9   :  { %v908_v8 = vpop.f32.mrb[44].mxu1 }
 0x3da   :  { %v2030_v6 = vpop.f32.mrb[45].mxu1  ;;  %v909_v9 = vadd.f32 %v2886_v25, %v908_v8 }
 0x3db   :  { %v911_v17 = vpop.f32.mrb[46].mxu1 }
 0x3dc   :  { %v2031_v28 = vpop.f32.mrb[47].mxu1  ;;  %v994_v42 = vadd.f32 %v909_v9, %v2678_v60  ;;  %v912_v47 = vadd.f32 %v2886_v25, %v911_v17 }
 0x3de   :  { %vm1016_vm13 = vcmp.gt.f32.partialorder %v994_v42, 0.0 }
 0x3e1   :  { %v916_v54 = vpop.f32.mrb[48].mxu1 }
 0x3e2   :  { %v2034_v19 = vpop.f32.mrb[49].mxu1  ;;  %v917_v50 = vadd.f32 %v2886_v25, %v916_v54 }
 0x3e3   :  { %v919_v22 = vpop.f32.mrb[50].mxu1 }
 0x3e4   :  { %v2035_v23 = vpop.f32.mrb[51].mxu1  ;;  %v996_v48 = vadd.f32 %v917_v50, %v2689_v13  ;;  %v920_v6 = vadd.f32 %v2886_v25, %v919_v22 }
 0x3e6   :  { %v1040_v28 = vmul.f32 %v2893_v43, %v996_v48  ;;  %vm1018_vm4 = vcmp.gt.f32.partialorder %v996_v48, 0.0  ;;  %v997_v22 = vadd.f32 %v920_v6, %v2692_v0 }
 0x3e8   :  { %vm1019_vm6 = vcmp.gt.f32.partialorder %v997_v22, 0.0 }
 0x3e9   :  { %v924_v53 = vpop.f32.mrb[52].mxu1 }
 0x3ea   :  { %v2038_v32 = vpop.f32.mrb[53].mxu1  ;;  %v925_v54 = vadd.f32 %v2886_v25, %v924_v53 }
 0x3eb   :  { %v2881_v33 = vpop.f32.mrb[54].mxu1 }
 0x3ec   :  { %v2039_v62 = vpop.f32.mrb[55].mxu1 }
 0x3f1   :  { %v932_v34 = vpop.f32.mrb[56].mxu1 }
 0x3f2   :  { %v933_v35 = vadd.f32 %v2886_v25, %v932_v34  ;;  %v2042_v38 = vpop.f32.mrb[57].mxu1 }
 0x3f3   :  { %v935_v39 = vpop.f32.mrb[58].mxu1 }
 0x3f4   :  { %v1000_v29 = vadd.f32 %v933_v35, %v2714_v21  ;;  %v936_v14 = vadd.f32 %v2886_v25, %v935_v39  ;;  %v2043_v40 = vpop.f32.mrb[59].mxu1  ;;  %v1038_v21 = vmul.f32 %v2893_v43, %v994_v42 }
 0x3f5   :  { %v2934_v40 = vsel %vm1018_vm4, %v996_v48, %v1040_v28 }
 0x3f6   :  { %vm1022_vm11 = vcmp.gt.f32.partialorder %v1000_v29, 0.0  ;;  %v1044_v46 = vmul.f32 %v2893_v43, %v1000_v29  ;;  %v1001_v10 = vadd.f32 %v936_v14, %v2717_v18  ;;  %v995_v18 = vadd.f32 %v912_v47, %v2681_v20 }
 0x3f7   :  { %v2908_v3 = vsel %vm1016_vm13, %v994_v42, %v1038_v21  ;;  %v998_v42 = vadd.f32 %v925_v54, %v2700_v1  ;;  %v1041_v47 = vmul.f32 %v2893_v43, %v997_v22 }
 0x3f8   :  { %v2898_v11 = vsel %vm1022_vm11, %v1000_v29, %v1044_v46  ;;  %vm1023_vm12 = vcmp.gt.f32.partialorder %v1001_v10, 0.0  ;;  %v1045_v49 = vmul.f32 %v2893_v43, %v1001_v10  ;;  %vm1017_vm0 = vcmp.gt.f32.partialorder %v995_v18, 0.0 }
 0x3f9   :  { %v940_v51 = vpop.f32.mrb[60].mxu1  ;;  %v1089_v58 = vrot.slane %v2898_v11, 6  ;;  %v1042_v50 = vmul.f32 %v2893_v43, %v998_v42  ;;  %vm1020_vm8 = vcmp.gt.f32.partialorder %v998_v42, 0.0 }
 0x3fa   :  { %v1066_v60 = vsel %vm1023_vm12, %v1001_v10, %v1045_v49  ;;  %v941_v55 = vadd.f32 %v2886_v25, %v940_v51  ;;  %v2046_v57 = vpop.f32.mrb[61].mxu1  ;;  %v928_v49 = vadd.f32 %v2886_v25, %v2881_v33 }
 0x3fb   :  { %v1090_v59 = vrot.slane %v1066_v60, 6  ;;  %v943_v16 = vpop.f32.mrb[62].mxu1 }
 0x3fc   :  { %v1002_v44 = vadd.f32 %v941_v55, %v2725_v31  ;;  %v944_v41 = vadd.f32 %v2886_v25, %v943_v16  ;;  %v2047_v2 = vpop.f32.mrb[63].mxu1  ;;  %v1039_v31 = vmul.f32 %v2893_v43, %v995_v18 }
 0x3fd   :  { %v2912_v63 = vsel %vm1088_vm14, %v1089_v58, %v1090_v59  ;;  %v999_v58 = vadd.f32 %v928_v49, %v2703_v5 }
 0x3fe   :  { %vm1024_vm15 = vcmp.gt.f32.partialorder %v1002_v44, 0.0  ;;  %v1046_v7 = vmul.f32 %v2893_v43, %v1002_v44  ;;  %v1003_v20 = vadd.f32 %v944_v41, %v2728_v15  ;;  %v1111_v8 = vmax.f32 %v2908_v3, %v2912_v63 }
 0x3ff   :  { %v2924_v9 = vsel %vm1017_vm0, %v995_v18, %v1039_v31  ;;  %vm1021_vm10 = vcmp.gt.f32.partialorder %v999_v58, 0.0 }
 0x400   :  { %v1067_v17 = vsel %vm1024_vm15, %v1002_v44, %v1046_v7  ;;  %vm1025_vm1 = vcmp.gt.f32.partialorder %v1003_v20, 0.0  ;;  %v1047_v13 = vmul.f32 %v2893_v43, %v1003_v20  ;;  %v2960_v7 = vsel %vm1020_vm8, %v998_v42, %v1042_v50 }
 0x401   :  { %v1092_v19 = vrot.slane %v1067_v17, 6  ;;  %v948_v23 = vpop.f32.mrb[64].mxu1  ;;  %v1043_v17 = vmul.f32 %v2893_v43, %v999_v58  ;;  %vm1125_vm15 = vcmask 1043456  }
 0x402   :  { %v1068_v15 = vsel %vm1025_vm1, %v1003_v20, %v1047_v13  ;;  %v949_v32 = vadd.f32 %v2886_v25, %v948_v23  ;;  %v2050_v62 = vpop.f32.mrb[65].mxu1 }
 0x403   :  { %v2928_v34 = vsel %vm1088_vm14, %v1090_v59, %v1092_v19  ;;  %v1094_v35 = vrot.slane %v1068_v15, 6  ;;  %v951_v38 = vpop.f32.mrb[66].mxu1 }
 0x404   :  { %v1004_v39 = vadd.f32 %v949_v32, %v2736_v36  ;;  %v952_v53 = vadd.f32 %v2886_v25, %v951_v38  ;;  %v2051_v29 = vpop.f32.mrb[67].mxu1  ;;  %v1112_v14 = vmax.f32 %v2924_v9, %v2928_v34  ;;  %v2972_v32 = vsel %vm1021_vm10, %v999_v58, %v1043_v17 }
 0x405   :  { %v2938_v46 = vsel %vm1088_vm14, %v1092_v19, %v1094_v35 }
 0x406   :  { %v1113_v0 = vmax.f32 %v2934_v40, %v2938_v46  ;;  %vm1026_vm5 = vcmp.gt.f32.partialorder %v1004_v39, 0.0  ;;  %v1048_v10 = vmul.f32 %v2893_v43, %v1004_v39  ;;  %v1005_v36 = vadd.f32 %v952_v53, %v2739_v37 }
 0x407   :  { %v2950_v37 = vsel %vm1019_vm6, %v997_v22, %v1041_v47 }
 0x408   :  { %v1069_v21 = vsel %vm1026_vm5, %v1004_v39, %v1048_v10  ;;  %vm1027_vm7 = vcmp.gt.f32.partialorder %v1005_v36, 0.0  ;;  %v1049_v1 = vmul.f32 %v2893_v43, %v1005_v36 }
 0x409   :  { %v1096_v51 = vrot.slane %v1069_v21, 6  ;;  %v956_v60 = vpop.f32.mrb[68].mxu1 }
 0x40a   :  { %v1070_v55 = vsel %vm1027_vm7, %v1005_v36, %v1049_v1  ;;  %v957_v57 = vadd.f32 %v2886_v25, %v956_v60  ;;  %v2054_v18 = vpop.f32.mrb[69].mxu1 }
 0x40b   :  { %v2954_v33 = vsel %vm1088_vm14, %v1094_v35, %v1096_v51  ;;  %v1098_v59 = vrot.slane %v1070_v55, 6  ;;  %v959_v16 = vpop.f32.mrb[70].mxu1 }
 0x40c   :  { %v1114_v44 = vmax.f32 %v2950_v37, %v2954_v33  ;;  %v1006_v41 = vadd.f32 %v957_v57, %v2747_v52  ;;  %v960_v2 = vadd.f32 %v2886_v25, %v959_v16  ;;  %v2055_v48 = vpop.f32.mrb[71].mxu1 }
 0x40d   :  { %v2963_v20 = vsel %vm1088_vm14, %v1096_v51, %v1098_v59 }
 0x40e   :  { %vm1028_vm9 = vcmp.gt.f32.partialorder %v1006_v41, 0.0  ;;  %v1050_v5 = vmul.f32 %v2893_v43, %v1006_v41  ;;  %v1007_v31 = vadd.f32 %v960_v2, %v2750_v12  ;;  %v1115_v6 = vmax.f32 %v2960_v7, %v2963_v20 }
 0x410   :  { %v1071_v52 = vsel %vm1028_vm9, %v1006_v41, %v1050_v5  ;;  %vm1029_vm11 = vcmp.gt.f32.partialorder %v1007_v31, 0.0  ;;  %v1051_v13 = vmul.f32 %v2893_v43, %v1007_v31 }
 0x411   :  { %v1100_v28 = vrot.slane %v1071_v52, 6  ;;  %v964_v54 = vpop.f32.mrb[72].mxu1 }
 0x412   :  { %v1072_v19 = vsel %vm1029_vm11, %v1007_v31, %v1051_v13  ;;  %v965_v23 = vadd.f32 %v2886_v25, %v964_v54  ;;  %v2058_v15 = vpop.f32.mrb[73].mxu1  ;;  %vm1296_vm11 = vcmask 261120  }
 0x413   :  { %v2975_v12 = vsel %vm1088_vm14, %v1098_v59, %v1100_v28  ;;  %v1102_v62 = vrot.slane %v1072_v19, 6  ;;  %v967_v22 = vpop.f32.mrb[74].mxu1  ;;  %v1126_v49 = vrot.slane %v1072_v19, 4 }
 0x414   :  { %v1008_v35 = vadd.f32 %v965_v23, %v2758_v26  ;;  %v968_v38 = vadd.f32 %v2886_v25, %v967_v22  ;;  %v2059_v39 = vpop.f32.mrb[75].mxu1  ;;  %v1116_v53 = vmax.f32 %v2972_v32, %v2975_v12 }
 0x415   :  { %v2982_v29 = vsel %vm1088_vm14, %v1100_v28, %v1102_v62 }
 0x416   :  { %vm1030_vm12 = vcmp.gt.f32.partialorder %v1008_v35, 0.0  ;;  %v1052_v42 = vmul.f32 %v2893_v43, %v1008_v35  ;;  %v1009_v10 = vadd.f32 %v968_v38, %v2761_v27  ;;  %v1117_v36 = vmax.f32 %v2898_v11, %v2982_v29  ;;  %v1829_v11 = vld [vmem:[%s3124_s2 + $0x5] ss:$0 sm:$0xff] }
 0x418   :  { %v1073_v47 = vsel %vm1030_vm12, %v1008_v35, %v1052_v42  ;;  %vm1031_vm13 = vcmp.gt.f32.partialorder %v1009_v10, 0.0  ;;  %v1053_v26 = vmul.f32 %v2893_v43, %v1009_v10 }
 0x419   :  { %v1127_v21 = vrot.slane %v1073_v47, 4  ;;  %v972_v1 = vpop.f32.mrb[76].mxu1 }
 0x41a   :  { %v1074_v50 = vsel %vm1031_vm13, %v1009_v10, %v1053_v26  ;;  %v973_v51 = vadd.f32 %v2886_v25, %v972_v1  ;;  %v2062_v60 = vpop.f32.mrb[77].mxu1 }
 0x41b   :  { %v1129_v55 = vrot.slane %v1074_v50, 4  ;;  %v975_v57 = vpop.f32.mrb[78].mxu1  ;;  %v1128_v18 = vsel %vm1125_vm15, %v1126_v49, %v1127_v21 }
 0x41c   :  { %v1010_v27 = vadd.f32 %v973_v51, %v2769_v45  ;;  %v976_v58 = vadd.f32 %v2886_v25, %v975_v57  ;;  %v2063_v59 = vpop.f32.mrb[79].mxu1  ;;  %v1148_v16 = vmax.f32 %v1111_v8, %v1128_v18 }
 0x41d   :  { %v1130_v41 = vsel %vm1125_vm15, %v1127_v21, %v1129_v55 }
 0x41e   :  { %vm1032_vm0 = vcmp.gt.f32.partialorder %v1010_v27, 0.0  ;;  %v1054_v2 = vmul.f32 %v2893_v43, %v1010_v27  ;;  %v1011_v48 = vadd.f32 %v976_v58, %v2772_v56  ;;  %v1149_v5 = vmax.f32 %v1112_v14, %v1130_v41 }
 0x420   :  { %v1075_v31 = vsel %vm1032_vm0, %v1010_v27, %v1054_v2  ;;  %vm1033_vm1 = vcmp.gt.f32.partialorder %v1011_v48, 0.0  ;;  %v1055_v45 = vmul.f32 %v2893_v43, %v1011_v48  ;;  %v3003_v17 = vpack.c.bf16 %v1149_v5, %v1148_v16 }
 0x421   :  { %v1131_v52 = vrot.slane %v1075_v31, 4  ;;  %v980_v3 = vpop.f32.mrb[80].mxu1 }
 0x422   :  { %v1076_v63 = vsel %vm1033_vm1, %v1011_v48, %v1055_v45  ;;  %v981_v8 = vadd.f32 %v2886_v25, %v980_v3  ;;  %v2066_v13 = vpop.f32.mrb[81].mxu1  ;;  %2074 = vmatprep.mubr.msk.bf16.mxu0 %vm598_vm3, %v3003_v17 }
 0x423   :  { %v1132_v56 = vsel %vm1125_vm15, %v1129_v55, %v1131_v52  ;;  %v1133_v28 = vrot.slane %v1076_v63, 4  ;;  %v983_v9 = vpop.f32.mrb[82].mxu1 }
 0x424   :  { %v1150_v34 = vmax.f32 %v1113_v0, %v1132_v56  ;;  %v1012_v14 = vadd.f32 %v981_v8, %v2780_v61  ;;  %v984_v54 = vadd.f32 %v2886_v25, %v983_v9  ;;  %v2067_v19 = vpop.f32.mrb[83].mxu1 }
 0x425   :  { %v1134_v23 = vsel %vm1125_vm15, %v1131_v52, %v1133_v28 }
 0x426   :  { %v1151_v15 = vmax.f32 %v1114_v44, %v1134_v23  ;;  %vm1034_vm4 = vcmp.gt.f32.partialorder %v1012_v14, 0.0  ;;  %v1056_v32 = vmul.f32 %v2893_v43, %v1012_v14  ;;  %v1013_v12 = vadd.f32 %v984_v54, %v2783_v24 }
 0x428   :  { %v3020_v62 = vpack.c.bf16 %v1151_v15, %v1150_v34  ;;  %v1077_v40 = vsel %vm1034_vm4, %v1012_v14, %v1056_v32  ;;  %vm1035_vm5 = vcmp.gt.f32.partialorder %v1013_v12, 0.0  ;;  %v1057_v61 = vmul.f32 %v2893_v43, %v1013_v12 }
 0x429   :  { %v1135_v46 = vrot.slane %v1077_v40, 4  ;;  %v2157_v40 = vld [vmem:[%s3123_s1 + $0x50] sm:$0xff]  }
 0x42a   :  { %v1078_v0 = vsel %vm1035_vm5, %v1013_v12, %v1057_v61  ;;  %2075 = vmatmul.mubr.msk.bf16.vlgmr.msra.gmra.mrb[44].mxu0 %vm598_vm3, %v3020_v62  ;;  %v2156_v12 = vld [vmem:[%s3123_s1 + $0x48] sm:$0xff]   ;;  %v1460_v61 = vstv %s1848_s16  ;;  %vm1478_vm5 = vcmask 1045504  }
 0x42b   :  { %v1137_v22 = vrot.slane %v1078_v0, 4  ;;  %v1136_v37 = vsel %vm1125_vm15, %v1133_v28, %v1135_v46 }
 0x42c   :  { %v1152_v33 = vmax.f32 %v1115_v6, %v1136_v37 }
 0x42d   :  { %v1138_v24 = vsel %vm1125_vm15, %v1135_v46, %v1137_v22 }
 0x42e   :  { %v1153_v44 = vmax.f32 %v1116_v53, %v1138_v24 }
 0x430   :  { %v3030_v35 = vpack.c.bf16 %v1153_v44, %v1152_v33 }
 0x432   :  { %2078 = vmatprep.mubr.msk.bf16.mxu0 %vm598_vm3, %v3030_v35 }
 0x46a   :  { %v988_v38 = vpop.f32.mrb[84].mxu1 }
 0x46b   :  { %v989_v39 = vadd.f32 %v2886_v25, %v988_v38  ;;  %v2070_v42 = vpop.f32.mrb[85].mxu1  ;;  %v2153_v25 = vld [vmem:[%s3123_s1 + $0x38] sm:$0xff]  }
 0x46c   :  { %v991_v10 = vpop.f32.mrb[86].mxu1  ;;  %2082 = vmatprep.subr.bf16.mxu0 %v2153_v25 }
 0x46d   :  { %v1014_v47 = vadd.f32 %v989_v39, %v2791_v4  ;;  %v2071_v26 = vpop.f32.mrb[87].mxu1  ;;  %2083 = vmatpush3.bf16.msra.mxu0 %v2153_v25  ;;  %v2154_v4 = vld [vmem:[%s3123_s1 + $0x40] sm:$0xff]  }
 0x46e   :  { %2084 = vmatprep.subr.bf16.mxu0 %v2154_v4 }
 0x46f   :  { %vm1036_vm6 = vcmp.gt.f32.partialorder %v1014_v47, 0.0  ;;  %v1058_v7 = vmul.f32 %v2893_v43, %v1014_v47  ;;  %v2155_v43 = vld [vmem:[%s3123_s1 + $0x30] sm:$0xff]  }
 0x471   :  { %v1079_v20 = vsel %vm1036_vm6, %v1014_v47, %v1058_v7  ;;  %2085 = vmatpush3.bf16.msra.mxu0 %v2154_v4 }
 0x472   :  { %v1139_v6 = vrot.slane %v1079_v20, 4  ;;  %2094 = vmatprep.subr.bf16.mxu0 %v2155_v43 }
 0x474   :  { %v1140_v53 = vsel %vm1125_vm15, %v1137_v22, %v1139_v6 }
 0x475   :  { %v1154_v49 = vmax.f32 %v1117_v36, %v1140_v53  ;;  %v1256_v36 = vstv %s1835_s9 }
 0x477   :  { %v1158_v21 = vpack.c.bf16 %v1154_v49, %v1154_v49 }
 0x479   :  { %2079 = vmatmul.mubr.msk.bf16.gmra.mrb[48].mxu0 %vm598_vm3, %v1158_v21 }
 0x4fd   :  { %v2076_v29 = vpop.f32.mrb[44].mxu0 }
 0x4fe   :  { %v1227_v1 = vadd.f32 %v2076_v29, %v1829_v11  ;;  %v1218_v50 = vpop.f32.mrb[45].mxu0 }
 0x4ff   :  { %v1219_v51 = vadd.f32 %v1829_v11, %v1218_v50  ;;  %v2077_v60 = vpop.f32.mrb[46].mxu0 }
 0x500   :  { %v1259_v55 = vmul.f32 %v1256_v36, %v1227_v1  ;;  %v1230_v57 = vadd.f32 %v2077_v60, %v1829_v11  ;;  %v1221_v18 = vpop.f32.mrb[47].mxu0  ;;  %vm1251_vm7 = vcmp.gt.f32.partialorder %v1227_v1, 0.0 }
 0x501   :  { %v1257_v27 = vmul.f32 %v1256_v36, %v1219_v51  ;;  %v1222_v58 = vadd.f32 %v1829_v11, %v1221_v18  ;;  %vm1249_vm8 = vcmp.gt.f32.partialorder %v1219_v51, 0.0 }
 0x502   :  { %vm1252_vm9 = vcmp.gt.f32.partialorder %v1230_v57, 0.0  ;;  %v1260_v59 = vmul.f32 %v1256_v36, %v1230_v57  ;;  %v1266_v41 = vsel %vm1251_vm7, %v1227_v1, %v1259_v55 }
 0x503   :  { %vm1250_vm10 = vcmp.gt.f32.partialorder %v1222_v58, 0.0  ;;  %v1258_v16 = vmul.f32 %v1256_v36, %v1222_v58  ;;  %v1264_v48 = vsel %vm1249_vm8, %v1219_v51, %v1257_v27 }
 0x504   :  { %v1267_v2 = vsel %vm1252_vm9, %v1230_v57, %v1260_v59 }
 0x505   :  { %v1272_v5 = vpack.c.bf16 %v1267_v2, %v1266_v41  ;;  %v1265_v31 = vsel %vm1250_vm10, %v1222_v58, %v1258_v16 }
 0x506   :  { %v1271_v45 = vpack.c.bf16 %v1265_v31, %v1264_v48 }
 0x508   :  { %2086 = vmatprep.mubr.msk.bf16.mxu0 %vm1296_vm11, %v1271_v45 }
 0x509   :  { %2087 = vmatmul.mubr.msk.bf16.vlgmr.msra.gmra.mrb[52].mxu0 %vm1296_vm11, %v1272_v5 }
 0x50a   :  { %2095 = vmatpush3.bf16.msra.mxu0 %v2155_v43 }
 0x50b   :  { %2104 = vmatprep.subr.bf16.mxu0 %v2156_v12 }
 0x54c   :  { %v2080_v52 = vpop.f32.mrb[48].mxu0 }
 0x54d   :  { %v1243_v3 = vadd.f32 %v2080_v52, %v1829_v11  ;;  %v1234_v63 = vpop.f32.mrb[49].mxu0 }
 0x54e   :  { %v1235_v8 = vadd.f32 %v1829_v11, %v1234_v63  ;;  %v2081_v13 = vpop.f32.mrb[50].mxu0 }
 0x54f   :  { %v1263_v56 = vmul.f32 %v1256_v36, %v1243_v3  ;;  %v1237_v28 = vpop.f32.mrb[51].mxu0  ;;  %vm1255_vm12 = vcmp.gt.f32.partialorder %v1243_v3, 0.0  ;;  %v2159_v13 = vld [vmem:[%s3123_s1 + $0x60] sm:$0xff]  }
 0x550   :  { %v1261_v9 = vmul.f32 %v1256_v36, %v1235_v8  ;;  %v1238_v34 = vadd.f32 %v1829_v11, %v1237_v28  ;;  %vm1253_vm13 = vcmp.gt.f32.partialorder %v1235_v8, 0.0 }
 0x551   :  { %v1270_v54 = vsel %vm1255_vm12, %v1243_v3, %v1263_v56  ;;  %v1849_v56 = vld [vmem:[%s3124_s2 + $0x7] ss:$0 sm:$0xff] }
 0x552   :  { %vm1254_vm0 = vcmp.gt.f32.partialorder %v1238_v34, 0.0  ;;  %v1262_v14 = vmul.f32 %v1256_v36, %v1238_v34  ;;  %v1268_v19 = vsel %vm1253_vm13, %v1235_v8, %v1261_v9  ;;  %v1274_v32 = vpack.c.bf16 %v1270_v54, %v1270_v54  ;;  %v2158_v8 = vld [vmem:[%s3123_s1 + $0x58] sm:$0xff]  }
 0x553   :  { %v1584_v9 = vstv %s1854_s22 }
 0x554   :  { %v1269_v23 = vsel %vm1254_vm0, %v1238_v34, %v1262_v14 }
 0x555   :  { %v1273_v15 = vpack.c.bf16 %v1269_v23, %v1268_v19 }
 0x557   :  { %2090 = vmatprep.mubr.msk.bf16.mxu0 %vm1296_vm11, %v1273_v15 }
 0x558   :  { %2091 = vmatmul.mubr.msk.bf16.gmra.mrb[56].mxu0 %vm1296_vm11, %v1274_v32 }
 0x559   :  { %2096 = vmatprep.mubr.msk.bf16.mxu0 %vm598_vm3, %v3003_v17  ;;  %v1836_v17 = vld [vmem:[%s3124_s2 + $0x6] ss:$0 sm:$0xff] }
 0x560   :  { %2097 = vmatmul.mubr.msk.bf16.vlgmr.msra.gmra.mrb[52].mxu0 %vm598_vm3, %v3020_v62 }
 0x561   :  { %2100 = vmatprep.mubr.msk.bf16.mxu0 %vm598_vm3, %v3030_v35  ;;  %2105 = vmatpush3.bf16.msra.mxu0 %v2156_v12 }
 0x562   :  { %2106 = vmatprep.subr.bf16.mxu0 %v2157_v40 }
 0x565   :  { %2107 = vmatpush3.bf16.msra.mxu0 %v2157_v40 }
 0x566   :  { %2112 = vmatprep.subr.bf16.mxu0 %v2158_v8 }
 0x568   :  { %2101 = vmatmul.mubr.msk.bf16.gmra.mrb[56].mxu0 %vm598_vm3, %v1158_v21 }
 0x633   :  { %v2098_v62 = vpop.f32.mrb[52].mxu0 }
 0x634   :  { %v2128_v46 = vadd.f32 %v2098_v62, %v1836_v17  ;;  %v1415_v0 = vpop.f32.mrb[53].mxu0 }
 0x635   :  { %v2129_v22 = vadd.f32 %v1836_v17, %v1415_v0  ;;  %v2099_v37 = vpop.f32.mrb[54].mxu0 }
 0x636   :  { %vm1455_vm3 = vcmp.gt.f32.partialorder %v2128_v46, 0.0  ;;  %v1463_v33 = vmul.f32 %v2128_v46, %v1460_v61  ;;  %v2130_v24 = vadd.f32 %v2099_v37, %v1836_v17  ;;  %v1418_v44 = vpop.f32.mrb[55].mxu0  ;;  %v2161_v37 = vld [vmem:[%s3123_s1 + $0x70] sm:$0xff]  }
 0x637   :  { %v1461_v39 = vmul.f32 %v2129_v22, %v1460_v61  ;;  %vm1453_vm4 = vcmp.gt.f32.partialorder %v2129_v22, 0.0  ;;  %v2131_v26 = vadd.f32 %v1836_v17, %v1418_v44 }
 0x638   :  { %v1470_v35 = vsel %vm1455_vm3, %v2128_v46, %v1463_v33  ;;  %vm1456_vm1 = vcmp.gt.f32.partialorder %v2130_v24, 0.0  ;;  %v1464_v38 = vmul.f32 %v2130_v24, %v1460_v61  ;;  %v1855_v33 = vld [vmem:[%s3124_s2 + $0x8] ss:$0 sm:$0xff] }
 0x639   :  { %v1479_v10 = vrot.slane %v1470_v35, 2  ;;  %v1468_v53 = vsel %vm1453_vm4, %v2129_v22, %v1461_v39  ;;  %v1462_v29 = vmul.f32 %v2131_v26, %v1460_v61  ;;  %vm1454_vm8 = vcmp.gt.f32.partialorder %v2131_v26, 0.0  ;;  %v2160_v22 = vld [vmem:[%s3123_s1 + $0x68] sm:$0xff]  }
 0x63a   :  { %v1471_v42 = vsel %vm1456_vm1, %v2130_v24, %v1464_v38  ;;  %v1675_v38 = vstv %s1860_s29 }
 0x63b   :  { %v1480_v47 = vrot.slane %v1471_v42, 2  ;;  %v2102_v7 = vpop.f32.mrb[56].mxu0  ;;  %v1469_v57 = vsel %vm1454_vm8, %v2131_v26, %v1462_v29 }
 0x63c   :  { %v2132_v20 = vadd.f32 %v2102_v7, %v1836_v17  ;;  %v1431_v6 = vpop.f32.mrb[57].mxu0 }
 0x63d   :  { %v1481_v49 = vsel %vm1478_vm5, %v1479_v10, %v1480_v47  ;;  %v2133_v21 = vadd.f32 %v1836_v17, %v1431_v6  ;;  %v2103_v25 = vpop.f32.mrb[58].mxu0 }
 0x63e   :  { %v1487_v4 = vmax.f32 %v1468_v53, %v1481_v49  ;;  %vm1459_vm6 = vcmp.gt.f32.partialorder %v2132_v20, 0.0  ;;  %v1467_v43 = vmul.f32 %v2132_v20, %v1460_v61  ;;  %v1434_v11 = vpop.f32.mrb[59].mxu0 }
 0x63f   :  { %vm1457_vm7 = vcmp.gt.f32.partialorder %v2133_v21, 0.0  ;;  %v1465_v36 = vmul.f32 %v2133_v21, %v1460_v61  ;;  %v2134_v1 = vadd.f32 %v1836_v17, %v1434_v11 }
 0x640   :  { %v1474_v50 = vsel %vm1459_vm6, %v2132_v20, %v1467_v43 }
 0x641   :  { %v1472_v51 = vsel %vm1457_vm7, %v2133_v21, %v1465_v36  ;;  %vm1458_vm9 = vcmp.gt.f32.partialorder %v2134_v1, 0.0  ;;  %v1466_v60 = vmul.f32 %v2134_v1, %v1460_v61  ;;  %v1495_v18 = vrot.slane %v1474_v50, 4 }
 0x642   :  { %v1482_v55 = vrot.slane %v1472_v51, 2  ;;  %v1492_v16 = vrot.slane %v1472_v51, 4 }
 0x643   :  { %v1473_v27 = vsel %vm1458_vm9, %v2134_v1, %v1466_v60 }
 0x644   :  { %v1483_v58 = vsel %vm1478_vm5, %v1480_v47, %v1482_v55  ;;  %v1489_v59 = vmax.f32 %v1470_v35, %v1482_v55  ;;  %v1493_v41 = vrot.slane %v1473_v27, 4 }
 0x645   :  { %v1488_v2 = vmax.f32 %v1469_v57, %v1483_v58 }
 0x646   :  { %v1502_v48 = vmax.f32 %v1489_v59, %v1495_v18  ;;  %v1494_v5 = vsel %vm1125_vm15, %v1492_v16, %v1493_v41  ;;  %v1496_v31 = vsel %vm1125_vm15, %v1493_v41, %v1495_v18  ;;  %v1861_v59 = vld [vmem:[%s3124_s2 + $0x9] ss:$0 sm:$0xff] }
 0x647   :  { %v1500_v45 = vmax.f32 %v1487_v4, %v1494_v5  ;;  %v1501_v52 = vmax.f32 %v1488_v2, %v1496_v31 }
 0x648   :  { %v1504_v63 = vpack.c.bf16 %v1502_v48, %v1502_v48 }
 0x649   :  { %v1503_v3 = vpack.c.bf16 %v1501_v52, %v1500_v45 }
 0x64b   :  { %2108 = vmatprep.mubr.msk.bf16.mxu0 %vm1296_vm11, %v1503_v3 }
 0x64c   :  { %2109 = vmatmul.mubr.msk.bf16.vlgmr.msra.gmra.mrb[60].mxu0 %vm1296_vm11, %v1504_v63 }
 0x64d   :  { %2113 = vmatpush3.bf16.msra.mxu0 %v2158_v8 }
 0x64e   :  { %2114 = vmatprep.subr.bf16.mxu0 %v2159_v13 }
 0x651   :  { %2115 = vmatpush3.bf16.msra.mxu0 %v2159_v13 }
 0x652   :  { %2120 = vmatprep.subr.bf16.mxu0 %v2243_v30 }
 0x71f   :  { %v2110_v28 = vpop.f32.mrb[60].mxu0 }
 0x720   :  { %v1575_v34 = vadd.f32 %v2110_v28, %v1849_v56  ;;  %v1566_v14 = vpop.f32.mrb[61].mxu0 }
 0x721   :  { %v1567_v54 = vadd.f32 %v1849_v56, %v1566_v14  ;;  %v2111_v19 = vpop.f32.mrb[62].mxu0 }
 0x722   :  { %v1587_v23 = vmul.f32 %v1584_v9, %v1575_v34  ;;  %v1569_v15 = vpop.f32.mrb[63].mxu0  ;;  %vm1583_vm10 = vcmp.gt.f32.partialorder %v1575_v34, 0.0 }
 0x723   :  { %v1585_v32 = vmul.f32 %v1584_v9, %v1567_v54  ;;  %v1570_v12 = vadd.f32 %v1849_v56, %v1569_v15  ;;  %vm1581_vm12 = vcmp.gt.f32.partialorder %v1567_v54, 0.0 }
 0x724   :  { %v1590_v17 = vsel %vm1583_vm10, %v1575_v34, %v1587_v23 }
 0x725   :  { %vm1582_vm13 = vcmp.gt.f32.partialorder %v1570_v12, 0.0  ;;  %v1586_v40 = vmul.f32 %v1584_v9, %v1570_v12  ;;  %v1588_v62 = vsel %vm1581_vm12, %v1567_v54, %v1585_v32  ;;  %v1592_v0 = vpack.c.bf16 %v1590_v17, %v1590_v17 }
 0x727   :  { %v1589_v61 = vsel %vm1582_vm13, %v1570_v12, %v1586_v40 }
 0x728   :  { %v1591_v46 = vpack.c.bf16 %v1589_v61, %v1588_v62 }
 0x72a   :  { %2116 = vmatprep.mubr.msk.bf16.mxu0 %vm1296_vm11, %v1591_v46 }
 0x72b   :  { %2117 = vmatmul.mubr.msk.bf16.vlgmr.msra.gmra.mrb[64].mxu0 %vm1296_vm11, %v1592_v0 }
 0x72c   :  { %2124 = vmatprep.mubr.msk.bf16.mxu0 %vm2244_vm2, %v2243_v30  ;;  %2121 = vmatpush3.bf16.msra.mxu0 %v2160_v22 }
 0x72d   :  { %2122 = vmatprep.subr.bf16.mxu0 %v2243_v30 }
 0x730   :  { %2123 = vmatpush3.bf16.msra.mxu0 %v2161_v37 }
 0x7fe   :  { %v2118_v24 = vpop.f32.mrb[64].mxu0 }
 0x7ff   :  { %v1663_v44 = vadd.f32 %v2118_v24, %v1855_v33  ;;  %v1654_v35 = vpop.f32.mrb[65].mxu0 }
 0x800   :  { %v1655_v39 = vadd.f32 %v1855_v33, %v1654_v35  ;;  %v2119_v42 = vpop.f32.mrb[66].mxu0 }
 0x801   :  { %v1670_v10 = vadd.f32 %v1663_v44, %v1502_v48  ;;  %v1657_v47 = vpop.f32.mrb[67].mxu0 }
 0x802   :  { %v1668_v26 = vadd.f32 %v1655_v39, %v1500_v45  ;;  %v1658_v7 = vadd.f32 %v1855_v33, %v1657_v47 }
 0x803   :  { %vm1674_vm2 = vcmp.gt.f32.partialorder %v1670_v10, 0.0  ;;  %v1678_v20 = vmul.f32 %v1675_v38, %v1670_v10 }
 0x804   :  { %vm1672_vm0 = vcmp.gt.f32.partialorder %v1668_v26, 0.0  ;;  %v1676_v30 = vmul.f32 %v1675_v38, %v1668_v26  ;;  %v1669_v6 = vadd.f32 %v1658_v7, %v1501_v52 }
 0x805   :  { %v1681_v53 = vsel %vm1674_vm2, %v1670_v10, %v1678_v20 }
 0x806   :  { %v1679_v49 = vsel %vm1672_vm0, %v1668_v26, %v1676_v30  ;;  %vm1673_vm3 = vcmp.gt.f32.partialorder %v1669_v6, 0.0  ;;  %v1677_v21 = vmul.f32 %v1675_v38, %v1669_v6  ;;  %v1691_v4 = vrot.slane %v1681_v53, 4 }
 0x807   :  { %v1684_v43 = vrot.slane %v1679_v49, 6 }
 0x808   :  { %v1680_v25 = vsel %vm1673_vm3, %v1669_v6, %v1677_v21 }
 0x809   :  { %v1685_v11 = vrot.slane %v1680_v25, 6  ;;  %v1690_v29 = vrot.slane %v1680_v25, 4 }
 0x80b   :  { %v1686_v36 = vsel %vm1088_vm14, %v1684_v43, %v1685_v11  ;;  %v1692_v1 = vsel %vm1125_vm15, %v1690_v29, %v1691_v4  ;;  %vm1768_vm14 = vcmask 123904  }
 0x80c   :  { %v1688_v50 = vmax.f32 %v1679_v49, %v1686_v36 }
 0x80e   :  { %v1694_v51 = vmax.f32 %v1688_v50, %v1692_v1 }
 0x810   :  { %v1696_v60 = vrot.slane %v1694_v51, 2  ;;  %v1699_v57 = vrot.slane %v1694_v51, 4 }
 0x812   :  { %v1698_v55 = vadd.f32 %v1696_v60, %v1694_v51 }
 0x814   :  { %v1701_v18 = vadd.f32 %v1699_v57, %v1698_v55 }
 0x816   :  { %v1702_v27 = vmul.f32 0.33333334, %v1701_v18 }
 0x818   :  { %v1703_v58 = vpack.c.bf16 %v1702_v27, %v1702_v27 }
 0x81a   :  { %2125 = vmatmul.mubr.msk.bf16.vlgmr.msra.gmra.mrb[68].mxu0 %vm1296_vm11, %v1703_v58 }
 0x8ed   :  { %v1762_v16 = vpop.f32.mrb[68].mxu0 }
 0x8ee   :  { %v1763_v41 = vadd.f32 %v1861_v59, %v1762_v16  ;;  %v2126_v2 = vpop.f32.mrb[69].mxu0 }
 0x8ef   :  { %v1765_v48 = vpop.f32.mrb[70].mxu0 }
 0x8f0   :  { %v2127_v5 = vpop.f32.mrb[71].mxu0  ;;  %1769 = vst.msk [vmem:[#allocation5] sm:$0x3] %vm1768_vm14, %v1763_v41 }
 0x8f1   :  { %2227 = shalt.err (!%p2224_p9)
}
 0x8f2   :  { %s2228_s2 = scalar_lea.hbm %s3126_s4, 32 }
 0x8f3   :  { %p2229_p10 = scmp.ne.s32.totalorder %s3126_s4, %s2228_s2  ;;  %p2232_p11 = scmp.lt.u32.totalorder %s2228_s2, %s3126_s4 }
 0x8f5   :  { %p2234_p12 = pnand %p2232_p11, %p2229_p10 }
 0x8f7   :  { %2237 = shalt.err (!%p2234_p12)
}
 0x8f8   :  { %1779 = dma.vmem_to_hbm [thread:$0]  %s1777_s0, 32, %s3126_s4, [#allocation3]  }
 0x8f9   :  { %2240 = dma.done.wait [#allocation3], 32  }
 0x8fa   :  { %2241 = vsyncadd [#allocation3], 4294967264 }
 0x8fb   :  { %1783 = vsyncpa [#allocation3], 1 }
 0x8fc   :  { %1784 = vsyncpa [#allocation4], 1 }

</bundles_post_ra>
